<compile_context>
chip_gen: v6e
topology: v6e:2x2x1
jax: 0.10.0
libtpu: 0.0.40
codegen_flags: <defaults>
</compile_context>

<pallas_src>
import jax
import jax.numpy as jnp
from jax.experimental import pallas as pl
from jax.experimental.pallas import tpu as pltpu

EPS = 1e-5  # PyTorch BatchNorm default eps


# ------------------------------ helpers ------------------------------

def _full_spec(shape):
    nd = len(shape)
    return pl.BlockSpec(shape, lambda i, _nd=nd: (0,) * _nd)


def _round_up(n, m):
    return ((n + m - 1) // m) * m


# --------------------------- fused Pallas kernel ---------------------------

def _make_forward_kernel(num_blocks, nresblocks, num_fc):
    """Builds the fused whole-network kernel body for a static config."""

    def kernel(*refs):
        feat_ref = refs[-1]        # VMEM scratch for stacked conv features
        out_ref = refs[-2]         # (nclasses, B)
        it = iter(refs[:-2])
        x_ref = next(it)

        # Zero once: channel-padding rows are contracted against zero weight
        # columns, so they only need to be finite (never NaN from stale VMEM).
        feat_ref[...] = jnp.zeros_like(feat_ref)

        def mesh_conv(h, w_ref, g13s, g24s, g13d, g24d):
            """MeshConv (Conv2d (1,5), no bias) on batch-stacked h: (C_in, B*E).

            Gathers are folded into bf16 block-diagonal (B*E, B*E) matrices of
            +/-1 entries (exact in bf16).  The five symmetric-feature taps are
            staged into the channel-padded scratch and contracted with ONE
            bf16 MXU matmul against the prefused (C_out, 5*C_pad) weight.
            """
            c_in, n = h.shape
            c_pad = w_ref.shape[1] // 5
            hb = h.astype(jnp.bfloat16)
            f32 = jnp.float32
            x13s = jnp.dot(hb, g13s, preferred_element_type=f32)
            x24s = jnp.dot(hb, g24s, preferred_element_type=f32)
            x13d = jnp.abs(jnp.dot(hb, g13d, preferred_element_type=f32))
            x24d = jnp.abs(jnp.dot(hb, g24d, preferred_element_type=f32))
            # MeshCNN symmetric-feature order: [x, x1+x3, x2+x4, |x1-x3|, |x2-x4|]
            taps = (h, x13s, x24s, x13d, x24d)
            for t, v in enumerate(taps):
                feat_ref[t * c_pad: t * c_pad + c_in, 0:n] = v
            feats = feat_ref[0:5 * c_pad, 0:n].astype(jnp.bfloat16)
            return jnp.dot(w_ref[...], feats, preferred_element_type=f32)

        h = x_ref[...]                                      # (C0, B*E0) f32

        for _blk in range(num_blocks):
            g13s = next(it)[...]
            g24s = next(it)[...]
            g13d = next(it)[...]
            g24d = next(it)[...]
            w0_ref = next(it)
            res_params = []
            for _j in range(nresblocks):
                gamma = next(it)[...]
                beta = next(it)[...]
                wj_ref = next(it)
                res_params.append((gamma, beta, wj_ref))
            pool = next(it)[...]

            # ---------------- MResConv ----------------
            h = mesh_conv(h, w0_ref, g13s, g24s, g13d, g24d)
            h1 = h
            for gamma, beta, wj_ref in res_params:
                y = jnp.maximum(h, 0.0)
                # BatchNorm2d, training-mode (biased) stats over batch*edges
                mean = jnp.mean(y, axis=1, keepdims=True)
                var = jnp.mean(jnp.square(y - mean), axis=1, keepdims=True)
                y = (y - mean) * (jax.lax.rsqrt(var + EPS) * gamma) + beta
                h = mesh_conv(y, wj_ref, g13s, g24s, g13d, g24d)
            # residual add + ReLU; the reference's following relu(NoNorm(x))
            # is a no-op on this non-negative result and is dropped.
            h = jnp.maximum(h + h1, 0.0)

            # ---------------- MeshPool (fused) ----------------
            # TODO(synk): true MeshCNN MeshPool is a data-dependent edge
            # collapse on mesh topology; it is replaced by a fixed
            # grouped-average pooling matrix (block-diagonal over batch).
            h = jnp.dot(h.astype(jnp.bfloat16), pool,
                        preferred_element_type=jnp.float32)

        # ---------- global average pool (AvgPool1d(res[-1])) ----------
        gp = next(it)[...]                                  # (B*E_last, B) bf16
        z = jnp.dot(h.astype(jnp.bfloat16), gp,
                    preferred_element_type=jnp.float32)     # (C_last, B)

        # ---------- FC head: relu(BatchNorm1d(fc(z))) ----------
        for _l in range(num_fc):
            w_t = next(it)[...]
            bias = next(it)[...]
            gamma = next(it)[...]
            beta = next(it)[...]
            z = jnp.dot(w_t, z.astype(jnp.bfloat16),
                        preferred_element_type=jnp.float32) + bias
            mean = jnp.mean(z, axis=1, keepdims=True)
            var = jnp.mean(jnp.square(z - mean), axis=1, keepdims=True)
            z = jnp.maximum((z - mean) * (jax.lax.rsqrt(var + EPS) * gamma)
                            + beta, 0.0)

        # ---------- last_fc (lane-dense (nclasses, B) store) ----------
        w_t = next(it)[...]
        bias = next(it)[...]
        out_ref[...] = jnp.dot(w_t, z.astype(jnp.bfloat16),
                               preferred_element_type=jnp.float32) + bias

    return kernel


# ---------------------- model glue (setup-time JAX only) ----------------------

def _gather_matrices(gemm, n_edges):
    """Fold create_GeMM neighbour gathers into (E, E) matrices so that for
    x of shape (C, E): x @ m13s == x1 + x3, x @ m13d == x1 - x3, etc.
    MeshCNN's -1 padding (zero column prepended, indices shifted) is mimicked
    by one_hot(-1) == 0."""
    one_hot = jax.nn.one_hot(gemm, n_edges, dtype=jnp.float32)      # (E, 4, E)
    g1, g2, g3, g4 = (one_hot[:, t, :].T for t in range(4))         # (E, E)
    return g1 + g3, g2 + g4, g1 - g3, g2 - g4                        # 13s,24s,13d,24d


def _block_diag(m, batch):
    rows, cols = m.shape
    out = jnp.zeros((batch * rows, batch * cols), m.dtype)
    for b in range(batch):
        out = out.at[b * rows:(b + 1) * rows, b * cols:(b + 1) * cols].set(m)
    return out


def _pool_matrix(e_in, e_out):
    g = e_in // e_out
    idx = jnp.arange(e_in)
    return jnp.zeros((e_in, e_out), jnp.float32).at[idx, idx // g].set(1.0 / g)


def _gp_matrix(e_last, batch):
    return _block_diag(jnp.full((e_last, 1), 1.0 / e_last, jnp.float32), batch)


def _fuse_conv_weight(w, c_pad):
    """w: (5, c_out, c_in) with w[t] = torch_weight[:, :, 0, t] (MeshCNN tap
    order [x, x1+x3, x2+x4, |x1-x3|, |x2-x4|]).  Returns (c_out, 5*c_pad) with
    each tap's c_in columns zero-padded to c_pad (8-aligned)."""
    _, c_out, c_in = w.shape
    blocks = []
    for t in range(5):
        wt = w[t]
        if c_in < c_pad:
            wt = jnp.pad(wt, ((0, 0), (0, c_pad - c_in)))
        blocks.append(wt)
    return jnp.concatenate(blocks, axis=1)


def mesh_conv_net_forward(x, params, gemms, res, nresblocks):
    """Whole MeshConvNet forward as a single fused pallas_call."""
    # TODO(synk): the matplotlib / tensorboard visualization in the reference
    # forward has no effect on the returned tensor and is omitted.
    batch, c0, e0 = x.shape
    num_blocks = len(params['blocks'])
    num_fc = len(params['fcs'])
    nclasses = params['last_w'].shape[1]
    bf16, f32 = jnp.bfloat16, jnp.float32

    # batch-stacked activation layout: (C, B*E), edges*batch on the lane axis
    x_stacked = jnp.transpose(x, (1, 0, 2)).reshape(c0, batch * e0).astype(f32)

    args = [x_stacked]
    c_pad_max, n_max = 8, batch * e0
    for i, blk in enumerate(params['blocks']):
        c_out, c_in = blk['conv0'].shape[1], blk['conv0'].shape[2]
        n_max = max(n_max, batch * res[i])
        g13s, g24s, g13d, g24d = _gather_matrices(gemms[i], res[i])
        args.extend(_block_diag(g, batch).astype(bf16)
                    for g in (g13s, g24s, g13d, g24d))
        c_pad0 = _round_up(c_in, 8)
        c_pad1 = _round_up(c_out, 8)
        c_pad_max = max(c_pad_max, c_pad0, c_pad1)
        args.append(_fuse_conv_weight(blk['conv0'], c_pad0).astype(bf16))
        for j in range(nresblocks):
            args.append(blk[f'bn{j + 1}_g'].reshape(c_out, 1).astype(f32))
            args.append(blk[f'bn{j + 1}_b'].reshape(c_out, 1).astype(f32))
            args.append(_fuse_conv_weight(blk[f'conv{j + 1}'], c_pad1).astype(bf16))
        args.append(_block_diag(_pool_matrix(res[i], res[i + 1]), batch).astype(bf16))
    args.append(_gp_matrix(res[-1], batch).astype(bf16))
    for fc in params['fcs']:
        f_out = fc['w'].shape[1]
        args.append(fc['w'].T.astype(bf16))
        args.append(fc['b'].reshape(f_out, 1).astype(f32))
        args.append(fc['bn_g'].reshape(f_out, 1).astype(f32))
        args.append(fc['bn_b'].reshape(f_out, 1).astype(f32))
    args.append(params['last_w'].T.astype(bf16))
    args.append(params['last_b'].reshape(nclasses, 1).astype(f32))

    kernel = _make_forward_kernel(num_blocks, nresblocks, num_fc)
    out = pl.pallas_call(
        kernel,
        grid=(1,),
        in_specs=[_full_spec(a.shape) for a in args],
        out_specs=_full_spec((nclasses, batch)),
        out_shape=jax.ShapeDtypeStruct((nclasses, batch), jnp.float32),
        scratch_shapes=[pltpu.VMEM((5 * c_pad_max, n_max), jnp.float32)],
        compiler_params=pltpu.CompilerParams(
            dimension_semantics=("arbitrary",),
            vmem_limit_bytes=32 * 1024 * 1024),
    )(*args)
    return out.T  # (batch, nclasses)


def init_params(key, k, fc_n, nclasses, nresblocks):
    keys = iter(jax.random.split(key, 128))
    params = {'blocks': []}
    for i in range(len(k) - 1):
        cin, cout = k[i], k[i + 1]
        # MeshConv weight stored as (tap, cout, cin); a PyTorch Conv2d weight
        # (cout, cin, 1, 5) maps via w[t, o, c] = w_pt[o, c, 0, t] with the
        # MeshCNN tap order [x, x1+x3, x2+x4, |x1-x3|, |x2-x4|].
        blk = {'conv0': 0.1 * jax.random.normal(next(keys), (5, cout, cin), jnp.float32)}
        for j in range(nresblocks):
            blk[f'bn{j + 1}_g'] = jnp.ones((cout,), jnp.float32)   # PyTorch BN defaults
            blk[f'bn{j + 1}_b'] = jnp.zeros((cout,), jnp.float32)
            blk[f'conv{j + 1}'] = 0.1 * jax.random.normal(next(keys), (5, cout, cout), jnp.float32)
        params['blocks'].append(blk)
    dims = [k[-1]] + list(fc_n)
    params['fcs'] = []
    for i in range(len(fc_n)):
        params['fcs'].append({
            'w': 0.1 * jax.random.normal(next(keys), (dims[i], dims[i + 1]), jnp.float32),
            'b': 0.1 * jax.random.normal(next(keys), (dims[i + 1],), jnp.float32),
            'bn_g': jnp.ones((dims[i + 1],), jnp.float32),
            'bn_b': jnp.zeros((dims[i + 1],), jnp.float32),
        })
    params['last_w'] = 0.1 * jax.random.normal(next(keys), (fc_n[-1], nclasses), jnp.float32)
    params['last_b'] = 0.1 * jax.random.normal(next(keys), (nclasses,), jnp.float32)
    return params


if __name__ == "__main__":
    # MeshConvNet(norm_layer=NoNorm, nf0=5, conv_res=[8,16], nclasses=4,
    #             input_res=16, pool_res=[8,4], fc_n=[32], nresblocks=1, dropout_p=0)
    B = 2
    nf0 = 5
    conv_res = [8, 16]
    nclasses = 4
    input_res = 16
    pool_res = [8, 4]
    fc_n = [32]
    nresblocks = 1

    k = [nf0] + conv_res
    res = [input_res] + pool_res

    key = jax.random.PRNGKey(0)
    k_x, k_gemm, k_p = jax.random.split(key, 3)

    # input edge features (B, C=nf0, E=input_res)
    x = jax.random.normal(k_x, (B, nf0, input_res), jnp.float32)

    # synthetic mesh connectivity: per-resolution 4-neighbour table (gemm_edges)
    gkeys = jax.random.split(k_gemm, len(res) - 1)
    gemms = [jax.random.randint(gkeys[i], (res[i], 4), 0, res[i])
             for i in range(len(res) - 1)]

    params = init_params(k_p, k, fc_n, nclasses, nresblocks)

    out = mesh_conv_net_forward(x, params, gemms, res, nresblocks)
    out = jax.block_until_ready(out)
    assert out.shape == (B, nclasses) and out.dtype == jnp.float32
    assert bool(jnp.all(jnp.isfinite(out)))
    print("KERNEL_OK")
</pallas_src>

<mosaic_0001>
module attributes {stable_mosaic.version = 11 : i64} {
  func.func @kernel(%arg0: i32, %arg1: memref<5x32xf32, #tpu.memory_space<vmem>>, %arg2: memref<32x32xbf16, #tpu.memory_space<vmem>>, %arg3: memref<32x32xbf16, #tpu.memory_space<vmem>>, %arg4: memref<32x32xbf16, #tpu.memory_space<vmem>>, %arg5: memref<32x32xbf16, #tpu.memory_space<vmem>>, %arg6: memref<8x40xbf16, #tpu.memory_space<vmem>>, %arg7: memref<8x1xf32, #tpu.memory_space<vmem>>, %arg8: memref<8x1xf32, #tpu.memory_space<vmem>>, %arg9: memref<8x40xbf16, #tpu.memory_space<vmem>>, %arg10: memref<32x16xbf16, #tpu.memory_space<vmem>>, %arg11: memref<16x16xbf16, #tpu.memory_space<vmem>>, %arg12: memref<16x16xbf16, #tpu.memory_space<vmem>>, %arg13: memref<16x16xbf16, #tpu.memory_space<vmem>>, %arg14: memref<16x16xbf16, #tpu.memory_space<vmem>>, %arg15: memref<16x40xbf16, #tpu.memory_space<vmem>>, %arg16: memref<16x1xf32, #tpu.memory_space<vmem>>, %arg17: memref<16x1xf32, #tpu.memory_space<vmem>>, %arg18: memref<16x80xbf16, #tpu.memory_space<vmem>>, %arg19: memref<16x8xbf16, #tpu.memory_space<vmem>>, %arg20: memref<8x2xbf16, #tpu.memory_space<vmem>>, %arg21: memref<32x16xbf16, #tpu.memory_space<vmem>>, %arg22: memref<32x1xf32, #tpu.memory_space<vmem>>, %arg23: memref<32x1xf32, #tpu.memory_space<vmem>>, %arg24: memref<32x1xf32, #tpu.memory_space<vmem>>, %arg25: memref<4x32xbf16, #tpu.memory_space<vmem>>, %arg26: memref<4x1xf32, #tpu.memory_space<vmem>>, %arg27: memref<4x2xf32, #tpu.memory_space<vmem>>, %arg28: memref<80x32xf32, #tpu.memory_space<vmem>>) attributes {dimension_semantics = [#tpu.dimension_semantics<arbitrary>], iteration_bounds = array<i64: 1>, scalar_prefetch = 0 : i64, scratch_operands = 1 : i64, tpu.core_type = #tpu.core_type<tc>, window_params = [{pipeline_mode = #tpu.pipeline_mode<synchronous>, transform_indices = @transform_0, window_bounds = array<i64: 5, 32>}, {pipeline_mode = #tpu.pipeline_mode<synchronous>, transform_indices = @transform_1, window_bounds = array<i64: 32, 32>}, {pipeline_mode = #tpu.pipeline_mode<synchronous>, transform_indices = @transform_2, window_bounds = array<i64: 32, 32>}, {pipeline_mode = #tpu.pipeline_mode<synchronous>, transform_indices = @transform_3, window_bounds = array<i64: 32, 32>}, {pipeline_mode = #tpu.pipeline_mode<synchronous>, transform_indices = @transform_4, window_bounds = array<i64: 32, 32>}, {pipeline_mode = #tpu.pipeline_mode<synchronous>, transform_indices = @transform_5, window_bounds = array<i64: 8, 40>}, {pipeline_mode = #tpu.pipeline_mode<synchronous>, transform_indices = @transform_6, window_bounds = array<i64: 8, 1>}, {pipeline_mode = #tpu.pipeline_mode<synchronous>, transform_indices = @transform_7, window_bounds = array<i64: 8, 1>}, {pipeline_mode = #tpu.pipeline_mode<synchronous>, transform_indices = @transform_8, window_bounds = array<i64: 8, 40>}, {pipeline_mode = #tpu.pipeline_mode<synchronous>, transform_indices = @transform_9, window_bounds = array<i64: 32, 16>}, {pipeline_mode = #tpu.pipeline_mode<synchronous>, transform_indices = @transform_10, window_bounds = array<i64: 16, 16>}, {pipeline_mode = #tpu.pipeline_mode<synchronous>, transform_indices = @transform_11, window_bounds = array<i64: 16, 16>}, {pipeline_mode = #tpu.pipeline_mode<synchronous>, transform_indices = @transform_12, window_bounds = array<i64: 16, 16>}, {pipeline_mode = #tpu.pipeline_mode<synchronous>, transform_indices = @transform_13, window_bounds = array<i64: 16, 16>}, {pipeline_mode = #tpu.pipeline_mode<synchronous>, transform_indices = @transform_14, window_bounds = array<i64: 16, 40>}, {pipeline_mode = #tpu.pipeline_mode<synchronous>, transform_indices = @transform_15, window_bounds = array<i64: 16, 1>}, {pipeline_mode = #tpu.pipeline_mode<synchronous>, transform_indices = @transform_16, window_bounds = array<i64: 16, 1>}, {pipeline_mode = #tpu.pipeline_mode<synchronous>, transform_indices = @transform_17, window_bounds = array<i64: 16, 80>}, {pipeline_mode = #tpu.pipeline_mode<synchronous>, transform_indices = @transform_18, window_bounds = array<i64: 16, 8>}, {pipeline_mode = #tpu.pipeline_mode<synchronous>, transform_indices = @transform_19, window_bounds = array<i64: 8, 2>}, {pipeline_mode = #tpu.pipeline_mode<synchronous>, transform_indices = @transform_20, window_bounds = array<i64: 32, 16>}, {pipeline_mode = #tpu.pipeline_mode<synchronous>, transform_indices = @transform_21, window_bounds = array<i64: 32, 1>}, {pipeline_mode = #tpu.pipeline_mode<synchronous>, transform_indices = @transform_22, window_bounds = array<i64: 32, 1>}, {pipeline_mode = #tpu.pipeline_mode<synchronous>, transform_indices = @transform_23, window_bounds = array<i64: 32, 1>}, {pipeline_mode = #tpu.pipeline_mode<synchronous>, transform_indices = @transform_24, window_bounds = array<i64: 4, 32>}, {pipeline_mode = #tpu.pipeline_mode<synchronous>, transform_indices = @transform_25, window_bounds = array<i64: 4, 1>}, {pipeline_mode = #tpu.pipeline_mode<synchronous>, transform_indices = @transform_26, window_bounds = array<i64: 4, 2>}]} {
    %cst = arith.constant 0.000000e+00 : f32
    %0 = vector.broadcast %cst : f32 to vector<80x32xf32>
    %c0 = arith.constant 0 : index
    %c0_0 = arith.constant 0 : index
    %1 = vector.load %arg28[%c0, %c0_0] : memref<80x32xf32, #tpu.memory_space<vmem>>, vector<80x32xf32>
    tpu.vector_store %arg28[%c0, %c0_0], %0 {strides = array<i32>} : memref<80x32xf32, #tpu.memory_space<vmem>>, vector<80x32xf32>,
    %c0_1 = arith.constant 0 : index
    %c0_2 = arith.constant 0 : index
    %2 = vector.load %arg1[%c0_1, %c0_2] : memref<5x32xf32, #tpu.memory_space<vmem>>, vector<5x32xf32>
    %c0_3 = arith.constant 0 : index
    %c0_4 = arith.constant 0 : index
    %3 = vector.load %arg2[%c0_3, %c0_4] : memref<32x32xbf16, #tpu.memory_space<vmem>>, vector<32x32xbf16>
    %c0_5 = arith.constant 0 : index
    %c0_6 = arith.constant 0 : index
    %4 = vector.load %arg3[%c0_5, %c0_6] : memref<32x32xbf16, #tpu.memory_space<vmem>>, vector<32x32xbf16>
    %c0_7 = arith.constant 0 : index
    %c0_8 = arith.constant 0 : index
    %5 = vector.load %arg4[%c0_7, %c0_8] : memref<32x32xbf16, #tpu.memory_space<vmem>>, vector<32x32xbf16>
    %c0_9 = arith.constant 0 : index
    %c0_10 = arith.constant 0 : index
    %6 = vector.load %arg5[%c0_9, %c0_10] : memref<32x32xbf16, #tpu.memory_space<vmem>>, vector<32x32xbf16>
    %c0_11 = arith.constant 0 : index
    %c0_12 = arith.constant 0 : index
    %7 = vector.load %arg7[%c0_11, %c0_12] : memref<8x1xf32, #tpu.memory_space<vmem>>, vector<8x1xf32>
    %c0_13 = arith.constant 0 : index
    %c0_14 = arith.constant 0 : index
    %8 = vector.load %arg8[%c0_13, %c0_14] : memref<8x1xf32, #tpu.memory_space<vmem>>, vector<8x1xf32>
    %c0_15 = arith.constant 0 : index
    %c0_16 = arith.constant 0 : index
    %9 = vector.load %arg10[%c0_15, %c0_16] : memref<32x16xbf16, #tpu.memory_space<vmem>>, vector<32x16xbf16>
    %10 = arith.truncf %2 : vector<5x32xf32> to vector<5x32xbf16>
    %cst_17 = arith.constant dense<0.000000e+00> : vector<5x32xf32>
    %11 = tpu.matmul %10, %3, %cst_17 {dimension_numbers = #tpu.dot_dimension_numbers<[1], [0], [0], [1], [0, 0, 1, 1], [], []>} : vector<5x32xbf16>, vector<32x32xbf16>, vector<5x32xf32> -> vector<5x32xf32>
    %cst_18 = arith.constant dense<0.000000e+00> : vector<5x32xf32>
    %12 = tpu.matmul %10, %4, %cst_18 {dimension_numbers = #tpu.dot_dimension_numbers<[1], [0], [0], [1], [0, 0, 1, 1], [], []>} : vector<5x32xbf16>, vector<32x32xbf16>, vector<5x32xf32> -> vector<5x32xf32>
    %cst_19 = arith.constant dense<0.000000e+00> : vector<5x32xf32>
    %13 = tpu.matmul %10, %5, %cst_19 {dimension_numbers = #tpu.dot_dimension_numbers<[1], [0], [0], [1], [0, 0, 1, 1], [], []>} : vector<5x32xbf16>, vector<32x32xbf16>, vector<5x32xf32> -> vector<5x32xf32>
    %14 = math.absf %13 : vector<5x32xf32>
    %cst_20 = arith.constant dense<0.000000e+00> : vector<5x32xf32>
    %15 = tpu.matmul %10, %6, %cst_20 {dimension_numbers = #tpu.dot_dimension_numbers<[1], [0], [0], [1], [0, 0, 1, 1], [], []>} : vector<5x32xbf16>, vector<32x32xbf16>, vector<5x32xf32> -> vector<5x32xf32>
    %16 = math.absf %15 : vector<5x32xf32>
    %c0_21 = arith.constant 0 : index
    %c0_22 = arith.constant 0 : index
    %17 = vector.load %arg28[%c0_21, %c0_22] : memref<80x32xf32, #tpu.memory_space<vmem>>, vector<5x32xf32>
    tpu.vector_store %arg28[%c0_21, %c0_22], %2 {strides = array<i32>} : memref<80x32xf32, #tpu.memory_space<vmem>>, vector<5x32xf32>,
    %c8 = arith.constant 8 : index
    %c0_23 = arith.constant 0 : index
    %18 = vector.load %arg28[%c8, %c0_23] : memref<80x32xf32, #tpu.memory_space<vmem>>, vector<5x32xf32>
    tpu.vector_store %arg28[%c8, %c0_23], %11 {strides = array<i32>} : memref<80x32xf32, #tpu.memory_space<vmem>>, vector<5x32xf32>,
    %c16 = arith.constant 16 : index
    %c0_24 = arith.constant 0 : index
    %19 = vector.load %arg28[%c16, %c0_24] : memref<80x32xf32, #tpu.memory_space<vmem>>, vector<5x32xf32>
    tpu.vector_store %arg28[%c16, %c0_24], %12 {strides = array<i32>} : memref<80x32xf32, #tpu.memory_space<vmem>>, vector<5x32xf32>,
    %c24 = arith.constant 24 : index
    %c0_25 = arith.constant 0 : index
    %20 = vector.load %arg28[%c24, %c0_25] : memref<80x32xf32, #tpu.memory_space<vmem>>, vector<5x32xf32>
    tpu.vector_store %arg28[%c24, %c0_25], %14 {strides = array<i32>} : memref<80x32xf32, #tpu.memory_space<vmem>>, vector<5x32xf32>,
    %c32 = arith.constant 32 : index
    %c0_26 = arith.constant 0 : index
    %21 = vector.load %arg28[%c32, %c0_26] : memref<80x32xf32, #tpu.memory_space<vmem>>, vector<5x32xf32>
    tpu.vector_store %arg28[%c32, %c0_26], %16 {strides = array<i32>} : memref<80x32xf32, #tpu.memory_space<vmem>>, vector<5x32xf32>,
    %c0_27 = arith.constant 0 : index
    %c0_28 = arith.constant 0 : index
    %22 = vector.load %arg28[%c0_27, %c0_28] : memref<80x32xf32, #tpu.memory_space<vmem>>, vector<40x32xf32>
    %23 = arith.truncf %22 : vector<40x32xf32> to vector<40x32xbf16>
    %c0_29 = arith.constant 0 : index
    %c0_30 = arith.constant 0 : index
    %24 = vector.load %arg6[%c0_29, %c0_30] : memref<8x40xbf16, #tpu.memory_space<vmem>>, vector<8x40xbf16>
    %cst_31 = arith.constant dense<0.000000e+00> : vector<8x32xf32>
    %25 = tpu.matmul %24, %23, %cst_31 {dimension_numbers = #tpu.dot_dimension_numbers<[1], [0], [0], [1], [0, 0, 1, 1], [], []>} : vector<8x40xbf16>, vector<40x32xbf16>, vector<8x32xf32> -> vector<8x32xf32>
    %cst_32 = arith.constant 0.000000e+00 : f32
    %26 = vector.broadcast %cst_32 : f32 to vector<8x32xf32>
    %27 = arith.maximumf %25, %26 : vector<8x32xf32>
    %cst_33 = arith.constant dense<0.000000e+00> : vector<8xf32>
    %28 = vector.multi_reduction <add>, %27, %cst_33 [1] : vector<8x32xf32> to vector<8xf32>
    %29 = vector.shape_cast %28 : vector<8xf32> to vector<8x1xf32>
    %cst_34 = arith.constant 3.200000e+01 : f32
    %30 = vector.broadcast %cst_34 : f32 to vector<8x1xf32>
    %31 = arith.divf %29, %30 : vector<8x1xf32>
    %32 = vector.broadcast %31 : vector<8x1xf32> to vector<8x32xf32>
    %33 = arith.subf %27, %32 : vector<8x32xf32>
    %34 = arith.mulf %33, %33 : vector<8x32xf32>
    %cst_35 = arith.constant dense<0.000000e+00> : vector<8xf32>
    %35 = vector.multi_reduction <add>, %34, %cst_35 [1] : vector<8x32xf32> to vector<8xf32>
    %36 = vector.shape_cast %35 : vector<8xf32> to vector<8x1xf32>
    %cst_36 = arith.constant 3.200000e+01 : f32
    %37 = vector.broadcast %cst_36 : f32 to vector<8x1xf32>
    %38 = arith.divf %36, %37 : vector<8x1xf32>
    %39 = vector.broadcast %31 : vector<8x1xf32> to vector<8x32xf32>
    %40 = arith.subf %27, %39 : vector<8x32xf32>
    %cst_37 = arith.constant 9.99999974E-6 : f32
    %41 = vector.broadcast %cst_37 : f32 to vector<8x1xf32>
    %42 = arith.addf %38, %41 : vector<8x1xf32>
    %43 = math.rsqrt %42 : vector<8x1xf32>
    %44 = arith.mulf %43, %7 : vector<8x1xf32>
    %45 = vector.broadcast %44 : vector<8x1xf32> to vector<8x32xf32>
    %46 = arith.mulf %40, %45 : vector<8x32xf32>
    %47 = vector.broadcast %8 : vector<8x1xf32> to vector<8x32xf32>
    %48 = arith.addf %46, %47 : vector<8x32xf32>
    %49 = arith.truncf %48 : vector<8x32xf32> to vector<8x32xbf16>
    %cst_38 = arith.constant dense<0.000000e+00> : vector<8x32xf32>
    %50 = tpu.matmul %49, %3, %cst_38 {dimension_numbers = #tpu.dot_dimension_numbers<[1], [0], [0], [1], [0, 0, 1, 1], [], []>} : vector<8x32xbf16>, vector<32x32xbf16>, vector<8x32xf32> -> vector<8x32xf32>
    %cst_39 = arith.constant dense<0.000000e+00> : vector<8x32xf32>
    %51 = tpu.matmul %49, %4, %cst_39 {dimension_numbers = #tpu.dot_dimension_numbers<[1], [0], [0], [1], [0, 0, 1, 1], [], []>} : vector<8x32xbf16>, vector<32x32xbf16>, vector<8x32xf32> -> vector<8x32xf32>
    %cst_40 = arith.constant dense<0.000000e+00> : vector<8x32xf32>
    %52 = tpu.matmul %49, %5, %cst_40 {dimension_numbers = #tpu.dot_dimension_numbers<[1], [0], [0], [1], [0, 0, 1, 1], [], []>} : vector<8x32xbf16>, vector<32x32xbf16>, vector<8x32xf32> -> vector<8x32xf32>
    %53 = math.absf %52 : vector<8x32xf32>
    %cst_41 = arith.constant dense<0.000000e+00> : vector<8x32xf32>
    %54 = tpu.matmul %49, %6, %cst_41 {dimension_numbers = #tpu.dot_dimension_numbers<[1], [0], [0], [1], [0, 0, 1, 1], [], []>} : vector<8x32xbf16>, vector<32x32xbf16>, vector<8x32xf32> -> vector<8x32xf32>
    %55 = math.absf %54 : vector<8x32xf32>
    %c0_42 = arith.constant 0 : index
    %c0_43 = arith.constant 0 : index
    %56 = vector.load %arg28[%c0_42, %c0_43] : memref<80x32xf32, #tpu.memory_space<vmem>>, vector<8x32xf32>
    tpu.vector_store %arg28[%c0_42, %c0_43], %48 {strides = array<i32>} : memref<80x32xf32, #tpu.memory_space<vmem>>, vector<8x32xf32>,
    %c8_44 = arith.constant 8 : index
    %c0_45 = arith.constant 0 : index
    %57 = vector.load %arg28[%c8_44, %c0_45] : memref<80x32xf32, #tpu.memory_space<vmem>>, vector<8x32xf32>
    tpu.vector_store %arg28[%c8_44, %c0_45], %50 {strides = array<i32>} : memref<80x32xf32, #tpu.memory_space<vmem>>, vector<8x32xf32>,
    %c16_46 = arith.constant 16 : index
    %c0_47 = arith.constant 0 : index
    %58 = vector.load %arg28[%c16_46, %c0_47] : memref<80x32xf32, #tpu.memory_space<vmem>>, vector<8x32xf32>
    tpu.vector_store %arg28[%c16_46, %c0_47], %51 {strides = array<i32>} : memref<80x32xf32, #tpu.memory_space<vmem>>, vector<8x32xf32>,
    %c24_48 = arith.constant 24 : index
    %c0_49 = arith.constant 0 : index
    %59 = vector.load %arg28[%c24_48, %c0_49] : memref<80x32xf32, #tpu.memory_space<vmem>>, vector<8x32xf32>
    tpu.vector_store %arg28[%c24_48, %c0_49], %53 {strides = array<i32>} : memref<80x32xf32, #tpu.memory_space<vmem>>, vector<8x32xf32>,
    %c32_50 = arith.constant 32 : index
    %c0_51 = arith.constant 0 : index
    %60 = vector.load %arg28[%c32_50, %c0_51] : memref<80x32xf32, #tpu.memory_space<vmem>>, vector<8x32xf32>
    tpu.vector_store %arg28[%c32_50, %c0_51], %55 {strides = array<i32>} : memref<80x32xf32, #tpu.memory_space<vmem>>, vector<8x32xf32>,
    %c0_52 = arith.constant 0 : index
    %c0_53 = arith.constant 0 : index
    %61 = vector.load %arg28[%c0_52, %c0_53] : memref<80x32xf32, #tpu.memory_space<vmem>>, vector<40x32xf32>
    %62 = arith.truncf %61 : vector<40x32xf32> to vector<40x32xbf16>
    %c0_54 = arith.constant 0 : index
    %c0_55 = arith.constant 0 : index
    %63 = vector.load %arg9[%c0_54, %c0_55] : memref<8x40xbf16, #tpu.memory_space<vmem>>, vector<8x40xbf16>
    %cst_56 = arith.constant dense<0.000000e+00> : vector<8x32xf32>
    %64 = tpu.matmul %63, %62, %cst_56 {dimension_numbers = #tpu.dot_dimension_numbers<[1], [0], [0], [1], [0, 0, 1, 1], [], []>} : vector<8x40xbf16>, vector<40x32xbf16>, vector<8x32xf32> -> vector<8x32xf32>
    %65 = arith.addf %64, %25 : vector<8x32xf32>
    %cst_57 = arith.constant 0.000000e+00 : f32
    %66 = vector.broadcast %cst_57 : f32 to vector<8x32xf32>
    %67 = arith.maximumf %65, %66 : vector<8x32xf32>
    %68 = arith.truncf %67 : vector<8x32xf32> to vector<8x32xbf16>
    %cst_58 = arith.constant dense<0.000000e+00> : vector<8x16xf32>
    %69 = tpu.matmul %68, %9, %cst_58 {dimension_numbers = #tpu.dot_dimension_numbers<[1], [0], [0], [1], [0, 0, 1, 1], [], []>} : vector<8x32xbf16>, vector<32x16xbf16>, vector<8x16xf32> -> vector<8x16xf32>
    %c0_59 = arith.constant 0 : index
    %c0_60 = arith.constant 0 : index
    %70 = vector.load %arg11[%c0_59, %c0_60] : memref<16x16xbf16, #tpu.memory_space<vmem>>, vector<16x16xbf16>
    %c0_61 = arith.constant 0 : index
    %c0_62 = arith.constant 0 : index
    %71 = vector.load %arg12[%c0_61, %c0_62] : memref<16x16xbf16, #tpu.memory_space<vmem>>, vector<16x16xbf16>
    %c0_63 = arith.constant 0 : index
    %c0_64 = arith.constant 0 : index
    %72 = vector.load %arg13[%c0_63, %c0_64] : memref<16x16xbf16, #tpu.memory_space<vmem>>, vector<16x16xbf16>
    %c0_65 = arith.constant 0 : index
    %c0_66 = arith.constant 0 : index
    %73 = vector.load %arg14[%c0_65, %c0_66] : memref<16x16xbf16, #tpu.memory_space<vmem>>, vector<16x16xbf16>
    %c0_67 = arith.constant 0 : index
    %c0_68 = arith.constant 0 : index
    %74 = vector.load %arg16[%c0_67, %c0_68] : memref<16x1xf32, #tpu.memory_space<vmem>>, vector<16x1xf32>
    %c0_69 = arith.constant 0 : index
    %c0_70 = arith.constant 0 : index
    %75 = vector.load %arg17[%c0_69, %c0_70] : memref<16x1xf32, #tpu.memory_space<vmem>>, vector<16x1xf32>
    %c0_71 = arith.constant 0 : index
    %c0_72 = arith.constant 0 : index
    %76 = vector.load %arg19[%c0_71, %c0_72] : memref<16x8xbf16, #tpu.memory_space<vmem>>, vector<16x8xbf16>
    %77 = arith.truncf %69 : vector<8x16xf32> to vector<8x16xbf16>
    %cst_73 = arith.constant dense<0.000000e+00> : vector<8x16xf32>
    %78 = tpu.matmul %77, %70, %cst_73 {dimension_numbers = #tpu.dot_dimension_numbers<[1], [0], [0], [1], [0, 0, 1, 1], [], []>} : vector<8x16xbf16>, vector<16x16xbf16>, vector<8x16xf32> -> vector<8x16xf32>
    %cst_74 = arith.constant dense<0.000000e+00> : vector<8x16xf32>
    %79 = tpu.matmul %77, %71, %cst_74 {dimension_numbers = #tpu.dot_dimension_numbers<[1], [0], [0], [1], [0, 0, 1, 1], [], []>} : vector<8x16xbf16>, vector<16x16xbf16>, vector<8x16xf32> -> vector<8x16xf32>
    %cst_75 = arith.constant dense<0.000000e+00> : vector<8x16xf32>
    %80 = tpu.matmul %77, %72, %cst_75 {dimension_numbers = #tpu.dot_dimension_numbers<[1], [0], [0], [1], [0, 0, 1, 1], [], []>} : vector<8x16xbf16>, vector<16x16xbf16>, vector<8x16xf32> -> vector<8x16xf32>
    %81 = math.absf %80 : vector<8x16xf32>
    %cst_76 = arith.constant dense<0.000000e+00> : vector<8x16xf32>
    %82 = tpu.matmul %77, %73, %cst_76 {dimension_numbers = #tpu.dot_dimension_numbers<[1], [0], [0], [1], [0, 0, 1, 1], [], []>} : vector<8x16xbf16>, vector<16x16xbf16>, vector<8x16xf32> -> vector<8x16xf32>
    %83 = math.absf %82 : vector<8x16xf32>
    %c0_77 = arith.constant 0 : index
    %c0_78 = arith.constant 0 : index
    %84 = vector.load %arg28[%c0_77, %c0_78] : memref<80x32xf32, #tpu.memory_space<vmem>>, vector<8x16xf32>
    tpu.vector_store %arg28[%c0_77, %c0_78], %69 {strides = array<i32>} : memref<80x32xf32, #tpu.memory_space<vmem>>, vector<8x16xf32>,
    %c8_79 = arith.constant 8 : index
    %c0_80 = arith.constant 0 : index
    %85 = vector.load %arg28[%c8_79, %c0_80] : memref<80x32xf32, #tpu.memory_space<vmem>>, vector<8x16xf32>
    tpu.vector_store %arg28[%c8_79, %c0_80], %78 {strides = array<i32>} : memref<80x32xf32, #tpu.memory_space<vmem>>, vector<8x16xf32>,
    %c16_81 = arith.constant 16 : index
    %c0_82 = arith.constant 0 : index
    %86 = vector.load %arg28[%c16_81, %c0_82] : memref<80x32xf32, #tpu.memory_space<vmem>>, vector<8x16xf32>
    tpu.vector_store %arg28[%c16_81, %c0_82], %79 {strides = array<i32>} : memref<80x32xf32, #tpu.memory_space<vmem>>, vector<8x16xf32>,
    %c24_83 = arith.constant 24 : index
    %c0_84 = arith.constant 0 : index
    %87 = vector.load %arg28[%c24_83, %c0_84] : memref<80x32xf32, #tpu.memory_space<vmem>>, vector<8x16xf32>
    tpu.vector_store %arg28[%c24_83, %c0_84], %81 {strides = array<i32>} : memref<80x32xf32, #tpu.memory_space<vmem>>, vector<8x16xf32>,
    %c32_85 = arith.constant 32 : index
    %c0_86 = arith.constant 0 : index
    %88 = vector.load %arg28[%c32_85, %c0_86] : memref<80x32xf32, #tpu.memory_space<vmem>>, vector<8x16xf32>
    tpu.vector_store %arg28[%c32_85, %c0_86], %83 {strides = array<i32>} : memref<80x32xf32, #tpu.memory_space<vmem>>, vector<8x16xf32>,
    %c0_87 = arith.constant 0 : index
    %c0_88 = arith.constant 0 : index
    %89 = vector.load %arg28[%c0_87, %c0_88] : memref<80x32xf32, #tpu.memory_space<vmem>>, vector<40x16xf32>
    %90 = arith.truncf %89 : vector<40x16xf32> to vector<40x16xbf16>
    %c0_89 = arith.constant 0 : index
    %c0_90 = arith.constant 0 : index
    %91 = vector.load %arg15[%c0_89, %c0_90] : memref<16x40xbf16, #tpu.memory_space<vmem>>, vector<16x40xbf16>
    %cst_91 = arith.constant dense<0.000000e+00> : vector<16x16xf32>
    %92 = tpu.matmul %91, %90, %cst_91 {dimension_numbers = #tpu.dot_dimension_numbers<[1], [0], [0], [1], [0, 0, 1, 1], [], []>} : vector<16x40xbf16>, vector<40x16xbf16>, vector<16x16xf32> -> vector<16x16xf32>
    %cst_92 = arith.constant 0.000000e+00 : f32
    %93 = vector.broadcast %cst_92 : f32 to vector<16x16xf32>
    %94 = arith.maximumf %92, %93 : vector<16x16xf32>
    %cst_93 = arith.constant dense<0.000000e+00> : vector<16xf32>
    %95 = vector.multi_reduction <add>, %94, %cst_93 [1] : vector<16x16xf32> to vector<16xf32>
    %96 = vector.shape_cast %95 : vector<16xf32> to vector<16x1xf32>
    %cst_94 = arith.constant 1.600000e+01 : f32
    %97 = vector.broadcast %cst_94 : f32 to vector<16x1xf32>
    %98 = arith.divf %96, %97 : vector<16x1xf32>
    %99 = vector.broadcast %98 : vector<16x1xf32> to vector<16x16xf32>
    %100 = arith.subf %94, %99 : vector<16x16xf32>
    %101 = arith.mulf %100, %100 : vector<16x16xf32>
    %cst_95 = arith.constant dense<0.000000e+00> : vector<16xf32>
    %102 = vector.multi_reduction <add>, %101, %cst_95 [1] : vector<16x16xf32> to vector<16xf32>
    %103 = vector.shape_cast %102 : vector<16xf32> to vector<16x1xf32>
    %cst_96 = arith.constant 1.600000e+01 : f32
    %104 = vector.broadcast %cst_96 : f32 to vector<16x1xf32>
    %105 = arith.divf %103, %104 : vector<16x1xf32>
    %106 = vector.broadcast %98 : vector<16x1xf32> to vector<16x16xf32>
    %107 = arith.subf %94, %106 : vector<16x16xf32>
    %cst_97 = arith.constant 9.99999974E-6 : f32
    %108 = vector.broadcast %cst_97 : f32 to vector<16x1xf32>
    %109 = arith.addf %105, %108 : vector<16x1xf32>
    %110 = math.rsqrt %109 : vector<16x1xf32>
    %111 = arith.mulf %110, %74 : vector<16x1xf32>
    %112 = vector.broadcast %111 : vector<16x1xf32> to vector<16x16xf32>
    %113 = arith.mulf %107, %112 : vector<16x16xf32>
    %114 = vector.broadcast %75 : vector<16x1xf32> to vector<16x16xf32>
    %115 = arith.addf %113, %114 : vector<16x16xf32>
    %116 = arith.truncf %115 : vector<16x16xf32> to vector<16x16xbf16>
    %cst_98 = arith.constant dense<0.000000e+00> : vector<16x16xf32>
    %117 = tpu.matmul %116, %70, %cst_98 {dimension_numbers = #tpu.dot_dimension_numbers<[1], [0], [0], [1], [0, 0, 1, 1], [], []>} : vector<16x16xbf16>, vector<16x16xbf16>, vector<16x16xf32> -> vector<16x16xf32>
    %cst_99 = arith.constant dense<0.000000e+00> : vector<16x16xf32>
    %118 = tpu.matmul %116, %71, %cst_99 {dimension_numbers = #tpu.dot_dimension_numbers<[1], [0], [0], [1], [0, 0, 1, 1], [], []>} : vector<16x16xbf16>, vector<16x16xbf16>, vector<16x16xf32> -> vector<16x16xf32>
    %cst_100 = arith.constant dense<0.000000e+00> : vector<16x16xf32>
    %119 = tpu.matmul %116, %72, %cst_100 {dimension_numbers = #tpu.dot_dimension_numbers<[1], [0], [0], [1], [0, 0, 1, 1], [], []>} : vector<16x16xbf16>, vector<16x16xbf16>, vector<16x16xf32> -> vector<16x16xf32>
    %120 = math.absf %119 : vector<16x16xf32>
    %cst_101 = arith.constant dense<0.000000e+00> : vector<16x16xf32>
    %121 = tpu.matmul %116, %73, %cst_101 {dimension_numbers = #tpu.dot_dimension_numbers<[1], [0], [0], [1], [0, 0, 1, 1], [], []>} : vector<16x16xbf16>, vector<16x16xbf16>, vector<16x16xf32> -> vector<16x16xf32>
    %122 = math.absf %121 : vector<16x16xf32>
    %c0_102 = arith.constant 0 : index
    %c0_103 = arith.constant 0 : index
    %123 = vector.load %arg28[%c0_102, %c0_103] : memref<80x32xf32, #tpu.memory_space<vmem>>, vector<16x16xf32>
    tpu.vector_store %arg28[%c0_102, %c0_103], %115 {strides = array<i32>} : memref<80x32xf32, #tpu.memory_space<vmem>>, vector<16x16xf32>,
    %c16_104 = arith.constant 16 : index
    %c0_105 = arith.constant 0 : index
    %124 = vector.load %arg28[%c16_104, %c0_105] : memref<80x32xf32, #tpu.memory_space<vmem>>, vector<16x16xf32>
    tpu.vector_store %arg28[%c16_104, %c0_105], %117 {strides = array<i32>} : memref<80x32xf32, #tpu.memory_space<vmem>>, vector<16x16xf32>,
    %c32_106 = arith.constant 32 : index
    %c0_107 = arith.constant 0 : index
    %125 = vector.load %arg28[%c32_106, %c0_107] : memref<80x32xf32, #tpu.memory_space<vmem>>, vector<16x16xf32>
    tpu.vector_store %arg28[%c32_106, %c0_107], %118 {strides = array<i32>} : memref<80x32xf32, #tpu.memory_space<vmem>>, vector<16x16xf32>,
    %c48 = arith.constant 48 : index
    %c0_108 = arith.constant 0 : index
    %126 = vector.load %arg28[%c48, %c0_108] : memref<80x32xf32, #tpu.memory_space<vmem>>, vector<16x16xf32>
    tpu.vector_store %arg28[%c48, %c0_108], %120 {strides = array<i32>} : memref<80x32xf32, #tpu.memory_space<vmem>>, vector<16x16xf32>,
    %c64 = arith.constant 64 : index
    %c0_109 = arith.constant 0 : index
    %127 = vector.load %arg28[%c64, %c0_109] : memref<80x32xf32, #tpu.memory_space<vmem>>, vector<16x16xf32>
    tpu.vector_store %arg28[%c64, %c0_109], %122 {strides = array<i32>} : memref<80x32xf32, #tpu.memory_space<vmem>>, vector<16x16xf32>,
    %c0_110 = arith.constant 0 : index
    %c0_111 = arith.constant 0 : index
    %128 = vector.load %arg28[%c0_110, %c0_111] : memref<80x32xf32, #tpu.memory_space<vmem>>, vector<80x16xf32>
    %129 = arith.truncf %128 : vector<80x16xf32> to vector<80x16xbf16>
    %c0_112 = arith.constant 0 : index
    %c0_113 = arith.constant 0 : index
    %130 = vector.load %arg18[%c0_112, %c0_113] : memref<16x80xbf16, #tpu.memory_space<vmem>>, vector<16x80xbf16>
    %cst_114 = arith.constant dense<0.000000e+00> : vector<16x16xf32>
    %131 = tpu.matmul %130, %129, %cst_114 {dimension_numbers = #tpu.dot_dimension_numbers<[1], [0], [0], [1], [0, 0, 1, 1], [], []>} : vector<16x80xbf16>, vector<80x16xbf16>, vector<16x16xf32> -> vector<16x16xf32>
    %132 = arith.addf %131, %92 : vector<16x16xf32>
    %cst_115 = arith.constant 0.000000e+00 : f32
    %133 = vector.broadcast %cst_115 : f32 to vector<16x16xf32>
    %134 = arith.maximumf %132, %133 : vector<16x16xf32>
    %135 = arith.truncf %134 : vector<16x16xf32> to vector<16x16xbf16>
    %cst_116 = arith.constant dense<0.000000e+00> : vector<16x8xf32>
    %136 = tpu.matmul %135, %76, %cst_116 {dimension_numbers = #tpu.dot_dimension_numbers<[1], [0], [0], [1], [0, 0, 1, 1], [], []>} : vector<16x16xbf16>, vector<16x8xbf16>, vector<16x8xf32> -> vector<16x8xf32>
    %c0_117 = arith.constant 0 : index
    %c0_118 = arith.constant 0 : index
    %137 = vector.load %arg20[%c0_117, %c0_118] : memref<8x2xbf16, #tpu.memory_space<vmem>>, vector<8x2xbf16>
    %138 = arith.truncf %136 : vector<16x8xf32> to vector<16x8xbf16>
    %cst_119 = arith.constant dense<0.000000e+00> : vector<16x2xf32>
    %139 = tpu.matmul %138, %137, %cst_119 {dimension_numbers = #tpu.dot_dimension_numbers<[1], [0], [0], [1], [0, 0, 1, 1], [], []>} : vector<16x8xbf16>, vector<8x2xbf16>, vector<16x2xf32> -> vector<16x2xf32>
    %c0_120 = arith.constant 0 : index
    %c0_121 = arith.constant 0 : index
    %140 = vector.load %arg21[%c0_120, %c0_121] : memref<32x16xbf16, #tpu.memory_space<vmem>>, vector<32x16xbf16>
    %c0_122 = arith.constant 0 : index
    %c0_123 = arith.constant 0 : index
    %141 = vector.load %arg22[%c0_122, %c0_123] : memref<32x1xf32, #tpu.memory_space<vmem>>, vector<32x1xf32>
    %c0_124 = arith.constant 0 : index
    %c0_125 = arith.constant 0 : index
    %142 = vector.load %arg23[%c0_124, %c0_125] : memref<32x1xf32, #tpu.memory_space<vmem>>, vector<32x1xf32>
    %c0_126 = arith.constant 0 : index
    %c0_127 = arith.constant 0 : index
    %143 = vector.load %arg24[%c0_126, %c0_127] : memref<32x1xf32, #tpu.memory_space<vmem>>, vector<32x1xf32>
    %144 = arith.truncf %139 : vector<16x2xf32> to vector<16x2xbf16>
    %cst_128 = arith.constant dense<0.000000e+00> : vector<32x2xf32>
    %145 = tpu.matmul %140, %144, %cst_128 {dimension_numbers = #tpu.dot_dimension_numbers<[1], [0], [0], [1], [0, 0, 1, 1], [], []>} : vector<32x16xbf16>, vector<16x2xbf16>, vector<32x2xf32> -> vector<32x2xf32>
    %146 = vector.broadcast %141 : vector<32x1xf32> to vector<32x2xf32>
    %147 = arith.addf %145, %146 : vector<32x2xf32>
    %cst_129 = arith.constant dense<0.000000e+00> : vector<32xf32>
    %148 = vector.multi_reduction <add>, %147, %cst_129 [1] : vector<32x2xf32> to vector<32xf32>
    %149 = vector.shape_cast %148 : vector<32xf32> to vector<32x1xf32>
    %cst_130 = arith.constant 2.000000e+00 : f32
    %150 = vector.broadcast %cst_130 : f32 to vector<32x1xf32>
    %151 = arith.divf %149, %150 : vector<32x1xf32>
    %152 = vector.broadcast %151 : vector<32x1xf32> to vector<32x2xf32>
    %153 = arith.subf %147, %152 : vector<32x2xf32>
    %154 = arith.mulf %153, %153 : vector<32x2xf32>
    %cst_131 = arith.constant dense<0.000000e+00> : vector<32xf32>
    %155 = vector.multi_reduction <add>, %154, %cst_131 [1] : vector<32x2xf32> to vector<32xf32>
    %156 = vector.shape_cast %155 : vector<32xf32> to vector<32x1xf32>
    %cst_132 = arith.constant 2.000000e+00 : f32
    %157 = vector.broadcast %cst_132 : f32 to vector<32x1xf32>
    %158 = arith.divf %156, %157 : vector<32x1xf32>
    %159 = vector.broadcast %151 : vector<32x1xf32> to vector<32x2xf32>
    %160 = arith.subf %147, %159 : vector<32x2xf32>
    %cst_133 = arith.constant 9.99999974E-6 : f32
    %161 = vector.broadcast %cst_133 : f32 to vector<32x1xf32>
    %162 = arith.addf %158, %161 : vector<32x1xf32>
    %163 = math.rsqrt %162 : vector<32x1xf32>
    %164 = arith.mulf %163, %142 : vector<32x1xf32>
    %165 = vector.broadcast %164 : vector<32x1xf32> to vector<32x2xf32>
    %166 = arith.mulf %160, %165 : vector<32x2xf32>
    %167 = vector.broadcast %143 : vector<32x1xf32> to vector<32x2xf32>
    %168 = arith.addf %166, %167 : vector<32x2xf32>
    %cst_134 = arith.constant 0.000000e+00 : f32
    %169 = vector.broadcast %cst_134 : f32 to vector<32x2xf32>
    %170 = arith.maximumf %168, %169 : vector<32x2xf32>
    %c0_135 = arith.constant 0 : index
    %c0_136 = arith.constant 0 : index
    %171 = vector.load %arg25[%c0_135, %c0_136] : memref<4x32xbf16, #tpu.memory_space<vmem>>, vector<4x32xbf16>
    %c0_137 = arith.constant 0 : index
    %c0_138 = arith.constant 0 : index
    %172 = vector.load %arg26[%c0_137, %c0_138] : memref<4x1xf32, #tpu.memory_space<vmem>>, vector<4x1xf32>
    %173 = arith.truncf %170 : vector<32x2xf32> to vector<32x2xbf16>
    %cst_139 = arith.constant dense<0.000000e+00> : vector<4x2xf32>
    %174 = tpu.matmul %171, %173, %cst_139 {dimension_numbers = #tpu.dot_dimension_numbers<[1], [0], [0], [1], [0, 0, 1, 1], [], []>} : vector<4x32xbf16>, vector<32x2xbf16>, vector<4x2xf32> -> vector<4x2xf32>
    %175 = vector.broadcast %172 : vector<4x1xf32> to vector<4x2xf32>
    %176 = arith.addf %174, %175 : vector<4x2xf32>
    %c0_140 = arith.constant 0 : index
    %c0_141 = arith.constant 0 : index
    %177 = vector.load %arg27[%c0_140, %c0_141] : memref<4x2xf32, #tpu.memory_space<vmem>>, vector<4x2xf32>
    tpu.vector_store %arg27[%c0_140, %c0_141], %176 {strides = array<i32>} : memref<4x2xf32, #tpu.memory_space<vmem>>, vector<4x2xf32>,
    return
  }
  func.func @transform_0(%arg0: i32) -> (i32, i32) {
    %c0_i32 = arith.constant 0 : i32
    %c0_i32_0 = arith.constant 0 : i32
    %c0_i32_1 = arith.constant 0 : i32
    return %c0_i32, %c0_i32_0 : i32, i32
  }
  func.func @transform_1(%arg0: i32) -> (i32, i32) {
    %c0_i32 = arith.constant 0 : i32
    %c0_i32_0 = arith.constant 0 : i32
    %c0_i32_1 = arith.constant 0 : i32
    return %c0_i32, %c0_i32_0 : i32, i32
  }
  func.func @transform_2(%arg0: i32) -> (i32, i32) {
    %c0_i32 = arith.constant 0 : i32
    %c0_i32_0 = arith.constant 0 : i32
    %c0_i32_1 = arith.constant 0 : i32
    return %c0_i32, %c0_i32_0 : i32, i32
  }
  func.func @transform_3(%arg0: i32) -> (i32, i32) {
    %c0_i32 = arith.constant 0 : i32
    %c0_i32_0 = arith.constant 0 : i32
    %c0_i32_1 = arith.constant 0 : i32
    return %c0_i32, %c0_i32_0 : i32, i32
  }
  func.func @transform_4(%arg0: i32) -> (i32, i32) {
    %c0_i32 = arith.constant 0 : i32
    %c0_i32_0 = arith.constant 0 : i32
    %c0_i32_1 = arith.constant 0 : i32
    return %c0_i32, %c0_i32_0 : i32, i32
  }
  func.func @transform_5(%arg0: i32) -> (i32, i32) {
    %c0_i32 = arith.constant 0 : i32
    %c0_i32_0 = arith.constant 0 : i32
    %c0_i32_1 = arith.constant 0 : i32
    return %c0_i32, %c0_i32_0 : i32, i32
  }
  func.func @transform_6(%arg0: i32) -> (i32, i32) {
    %c0_i32 = arith.constant 0 : i32
    %c0_i32_0 = arith.constant 0 : i32
    %c0_i32_1 = arith.constant 0 : i32
    return %c0_i32, %c0_i32_0 : i32, i32
  }
  func.func @transform_7(%arg0: i32) -> (i32, i32) {
    %c0_i32 = arith.constant 0 : i32
    %c0_i32_0 = arith.constant 0 : i32
    %c0_i32_1 = arith.constant 0 : i32
    return %c0_i32, %c0_i32_0 : i32, i32
  }
  func.func @transform_8(%arg0: i32) -> (i32, i32) {
    %c0_i32 = arith.constant 0 : i32
    %c0_i32_0 = arith.constant 0 : i32
    %c0_i32_1 = arith.constant 0 : i32
    return %c0_i32, %c0_i32_0 : i32, i32
  }
  func.func @transform_9(%arg0: i32) -> (i32, i32) {
    %c0_i32 = arith.constant 0 : i32
    %c0_i32_0 = arith.constant 0 : i32
    %c0_i32_1 = arith.constant 0 : i32
    return %c0_i32, %c0_i32_0 : i32, i32
  }
  func.func @transform_10(%arg0: i32) -> (i32, i32) {
    %c0_i32 = arith.constant 0 : i32
    %c0_i32_0 = arith.constant 0 : i32
    %c0_i32_1 = arith.constant 0 : i32
    return %c0_i32, %c0_i32_0 : i32, i32
  }
  func.func @transform_11(%arg0: i32) -> (i32, i32) {
    %c0_i32 = arith.constant 0 : i32
    %c0_i32_0 = arith.constant 0 : i32
    %c0_i32_1 = arith.constant 0 : i32
    return %c0_i32, %c0_i32_0 : i32, i32
  }
  func.func @transform_12(%arg0: i32) -> (i32, i32) {
    %c0_i32 = arith.constant 0 : i32
    %c0_i32_0 = arith.constant 0 : i32
    %c0_i32_1 = arith.constant 0 : i32
    return %c0_i32, %c0_i32_0 : i32, i32
  }
  func.func @transform_13(%arg0: i32) -> (i32, i32) {
    %c0_i32 = arith.constant 0 : i32
    %c0_i32_0 = arith.constant 0 : i32
    %c0_i32_1 = arith.constant 0 : i32
    return %c0_i32, %c0_i32_0 : i32, i32
  }
  func.func @transform_14(%arg0: i32) -> (i32, i32) {
    %c0_i32 = arith.constant 0 : i32
    %c0_i32_0 = arith.constant 0 : i32
    %c0_i32_1 = arith.constant 0 : i32
    return %c0_i32, %c0_i32_0 : i32, i32
  }
  func.func @transform_15(%arg0: i32) -> (i32, i32) {
    %c0_i32 = arith.constant 0 : i32
    %c0_i32_0 = arith.constant 0 : i32
    %c0_i32_1 = arith.constant 0 : i32
    return %c0_i32, %c0_i32_0 : i32, i32
  }
  func.func @transform_16(%arg0: i32) -> (i32, i32) {
    %c0_i32 = arith.constant 0 : i32
    %c0_i32_0 = arith.constant 0 : i32
    %c0_i32_1 = arith.constant 0 : i32
    return %c0_i32, %c0_i32_0 : i32, i32
  }
  func.func @transform_17(%arg0: i32) -> (i32, i32) {
    %c0_i32 = arith.constant 0 : i32
    %c0_i32_0 = arith.constant 0 : i32
    %c0_i32_1 = arith.constant 0 : i32
    return %c0_i32, %c0_i32_0 : i32, i32
  }
  func.func @transform_18(%arg0: i32) -> (i32, i32) {
    %c0_i32 = arith.constant 0 : i32
    %c0_i32_0 = arith.constant 0 : i32
    %c0_i32_1 = arith.constant 0 : i32
    return %c0_i32, %c0_i32_0 : i32, i32
  }
  func.func @transform_19(%arg0: i32) -> (i32, i32) {
    %c0_i32 = arith.constant 0 : i32
    %c0_i32_0 = arith.constant 0 : i32
    %c0_i32_1 = arith.constant 0 : i32
    return %c0_i32, %c0_i32_0 : i32, i32
  }
  func.func @transform_20(%arg0: i32) -> (i32, i32) {
    %c0_i32 = arith.constant 0 : i32
    %c0_i32_0 = arith.constant 0 : i32
    %c0_i32_1 = arith.constant 0 : i32
    return %c0_i32, %c0_i32_0 : i32, i32
  }
  func.func @transform_21(%arg0: i32) -> (i32, i32) {
    %c0_i32 = arith.constant 0 : i32
    %c0_i32_0 = arith.constant 0 : i32
    %c0_i32_1 = arith.constant 0 : i32
    return %c0_i32, %c0_i32_0 : i32, i32
  }
  func.func @transform_22(%arg0: i32) -> (i32, i32) {
    %c0_i32 = arith.constant 0 : i32
    %c0_i32_0 = arith.constant 0 : i32
    %c0_i32_1 = arith.constant 0 : i32
    return %c0_i32, %c0_i32_0 : i32, i32
  }
  func.func @transform_23(%arg0: i32) -> (i32, i32) {
    %c0_i32 = arith.constant 0 : i32
    %c0_i32_0 = arith.constant 0 : i32
    %c0_i32_1 = arith.constant 0 : i32
    return %c0_i32, %c0_i32_0 : i32, i32
  }
  func.func @transform_24(%arg0: i32) -> (i32, i32) {
    %c0_i32 = arith.constant 0 : i32
    %c0_i32_0 = arith.constant 0 : i32
    %c0_i32_1 = arith.constant 0 : i32
    return %c0_i32, %c0_i32_0 : i32, i32
  }
  func.func @transform_25(%arg0: i32) -> (i32, i32) {
    %c0_i32 = arith.constant 0 : i32
    %c0_i32_0 = arith.constant 0 : i32
    %c0_i32_1 = arith.constant 0 : i32
    return %c0_i32, %c0_i32_0 : i32, i32
  }
  func.func @transform_26(%arg0: i32) -> (i32, i32) {
    %c0_i32 = arith.constant 0 : i32
    %c0_i32_0 = arith.constant 0 : i32
    %c0_i32_1 = arith.constant 0 : i32
    return %c0_i32, %c0_i32_0 : i32, i32
  }
}

</mosaic_0001>

<bundles_post_ra>
// kernel: tpu_custom_call.1
= control target key start
LH: loop header
LB: loop body
LE: loop exit
PB: predicated region body
PF: predicated region fallthrough
CT: control target
= control target key end

     0   :  { %vm84_vm0 = vcmask 261120   ;;  %v1992_v0 = vmov 0.0   ;;  %vm1993_vm1 = vmmov 0   ;;  %vm332_vm2 = vcmask 258048   ;;  %s2505_s1 = inlined_call_operand.vmem [shape: bf16[32,32], index: 1, kind: input, shape index: {}]   ;;  %s2506_s2 = inlined_call_operand.vmem [shape: bf16[32,32], index: 2, kind: input, shape index: {}]   ;;  %s2507_s0 = inlined_call_operand.vmem [shape: f32[5,32], index: 0, kind: input, shape index: {}]   ;;  %s2508_s3 = inlined_call_operand.vmem [shape: bf16[32,32], index: 3, kind: input, shape index: {}]   ;;  %s2509_s4 = inlined_call_operand.vmem [shape: bf16[32,32], index: 4, kind: input, shape index: {}]   ;;  %s2510_s5 = inlined_call_operand.vmem [shape: bf16[8,40], index: 5, kind: input, shape index: {}]   ;;  %s2511_s6 = inlined_call_operand.vmem [shape: f32[8,1], index: 6, kind: input, shape index: {}]   ;;  %s2512_s7 = inlined_call_operand.vmem [shape: f32[8,1], index: 7, kind: input, shape index: {}]   ;;  %s2513_s8 = inlined_call_operand.vmem [shape: bf16[8,40], index: 8, kind: input, shape index: {}]   ;;  %s2514_s9 = inlined_call_operand.vmem [shape: bf16[32,16], index: 9, kind: input, shape index: {}]   ;;  %s2515_s10 = inlined_call_operand.vmem [shape: bf16[16,16], index: 10, kind: input, shape index: {}]   ;;  %s2516_s11 = inlined_call_operand.vmem [shape: bf16[16,16], index: 11, kind: input, shape index: {}]   ;;  %s2517_s12 = inlined_call_operand.vmem [shape: bf16[16,16], index: 12, kind: input, shape index: {}]   ;;  %s2518_s13 = inlined_call_operand.vmem [shape: bf16[16,16], index: 13, kind: input, shape index: {}]   ;;  %s2519_s14 = inlined_call_operand.vmem [shape: bf16[16,40], index: 14, kind: input, shape index: {}]   ;;  %s2520_s15 = inlined_call_operand.vmem [shape: f32[16,1], index: 15, kind: input, shape index: {}]   ;;  %s2521_s16 = inlined_call_operand.vmem [shape: f32[16,1], index: 16, kind: input, shape index: {}]   ;;  %s2522_s21 = inlined_call_operand.vmem [shape: f32[32,1], index: 21, kind: input, shape index: {}]   ;;  %s2523_s17 = inlined_call_operand.vmem [shape: bf16[16,80], index: 17, kind: input, shape index: {}]   ;;  %s2524_s18 = inlined_call_operand.vmem [shape: bf16[16,8], index: 18, kind: input, shape index: {}]   ;;  %s2525_s19 = inlined_call_operand.vmem [shape: bf16[8,2], index: 19, kind: input, shape index: {}]   ;;  %s2526_s20 = inlined_call_operand.vmem [shape: bf16[32,16], index: 20, kind: input, shape index: {}]   ;;  %s2527_s23 = inlined_call_operand.vmem [shape: f32[32,1], index: 23, kind: input, shape index: {}]   ;;  %s2528_s22 = inlined_call_operand.vmem [shape: f32[32,1], index: 22, kind: input, shape index: {}]   ;;  %s2529_s25 = inlined_call_operand.vmem [shape: f32[4,1], index: 25, kind: input, shape index: {}]   ;;  %s2530_s24 = inlined_call_operand.vmem [shape: bf16[4,32], index: 24, kind: input, shape index: {}]   ;;  %s2531_s26 = inlined_call_operand.vmem [shape: f32[4,2], index: 26, kind: output, shape index: {}]  }
   0x1   :  { %2537 = sst [smem:[#allocation3_spill]] %s2505_s1  ;;  %1764 = vmatprep.subr.bf16.mxu0 %v1992_v0  ;;  %1772 = vmatprep.subr.bf16.mxu1 %v1992_v0  ;;  %85 = vst.msk [vmem:[#allocation2] sm:$0xff] %vm84_vm0, %v1992_v0  ;;  %86 = vst.msk [vmem:[#allocation2 + $0x8] sm:$0xff] %vm84_vm0, %v1992_v0  ;;  %vm351_vm3 = vcmask 1043456   ;;  %vm347_vm4 = vcmask 326656   ;;  %v1994_v50 = vmov 0  }
   0x2   :  { %2538 = sst [smem:[#allocation4_spill]] %s2506_s2  ;;  %87 = vst.msk [vmem:[#allocation2 + $0x10] sm:$0xff] %vm84_vm0, %v1992_v0  ;;  %88 = vst.msk [vmem:[#allocation2 + $0x18] sm:$0xff] %vm84_vm0, %v1992_v0  ;;  %1768 = vmatprep.mubr.msk.bf16.mxu0 %vm1993_vm1, %v1992_v0  ;;  %1776 = vmatprep.mubr.msk.bf16.mxu1 %vm1993_vm1, %v1992_v0  ;;  %vm726_vm5 = vcmask 130048   ;;  %vm1234_vm6 = vcmask 654336   ;;  %vm1334_vm7 = vcmask 64512  }
   0x3   :  { %2539 = sst [smem:[#allocation5_spill]] %s2507_s0  ;;  %89 = vst.msk [vmem:[#allocation2 + $0x20] sm:$0xff] %vm84_vm0, %v1992_v0  ;;  %90 = vst.msk [vmem:[#allocation2 + $0x28] sm:$0xff] %vm84_vm0, %v1992_v0  ;;  %1957 = vset.pattern.permute.xlu1 %v1994_v50  ;;  %1958 = vset.pattern.permute.xlu0 %v1994_v50  ;;  %vm1484_vm8 = vcmask 15360   ;;  %vm1642_vm9 = vcmask 11264  }
   0x4   :  { %2540 = sst [smem:[#allocation6_spill]] %s2508_s3  ;;  %91 = vst.msk [vmem:[#allocation2 + $0x30] sm:$0xff] %vm84_vm0, %v1992_v0  ;;  %92 = vst.msk [vmem:[#allocation2 + $0x38] sm:$0xff] %vm84_vm0, %v1992_v0 }
   0x5   :  { %2541 = sst [smem:[#allocation7_spill]] %s2509_s4  ;;  %93 = vst.msk [vmem:[#allocation2 + $0x40] sm:$0xff] %vm84_vm0, %v1992_v0  ;;  %94 = vst.msk [vmem:[#allocation2 + $0x48] sm:$0xff] %vm84_vm0, %v1992_v0 }
   0x6   :  { %2542 = sst [smem:[#allocation8_spill]] %s2510_s5 }
   0x7   :  { %2543 = sst [smem:[#allocation9_spill]] %s2511_s6 }
   0x8   :  { %2544 = sst [smem:[#allocation10_spill]] %s2512_s7 }
   0x9   :  { %2545 = sst [smem:[#allocation11_spill]] %s2513_s8 }
   0xa   :  { %2546 = sst [smem:[#allocation12_spill]] %s2514_s9 }
   0xb   :  { %2547 = sst [smem:[#allocation13_spill]] %s2515_s10 }
   0xc   :  { %s2548_s7 = sld [smem:[#allocation3_spill]] }
   0xd   :  { %s2549_s4 = sld [smem:[#allocation4_spill]] }
   0xe   :  { %s2550_s10 = sld [smem:[#allocation5_spill]] }
   0xf   :  { %s2551_s27 = sld [smem:[#allocation6_spill]] }
  0x10   :  { %s2552_s28 = sld [smem:[#allocation7_spill]] }
  0x11   :  { %s2553_s1 = sld [smem:[#allocation8_spill]] }
  0x12   :  { %v1959_v1 = vld [vmem:[%s2548_s7 + $0x8] sm:$0xff]   ;;  %v1961_v3 = vld [vmem:[%s2548_s7] sm:$0xff]   ;;  %s2554_s6 = sld [smem:[#allocation9_spill]] }
  0x13   :  { %v2158_v2 = vld [vmem:[%s2549_s4 + $0x8] sm:$0xff]   ;;  %1765 = vmatpush3.bf16.msra.mxu0 %v1959_v1  ;;  %v2172_v4 = vld [vmem:[%s2549_s4] sm:$0xff]   ;;  %s2555_s3 = sld [smem:[#allocation10_spill]] }
  0x14   :  { %1773 = vmatpush3.bf16.msra.mxu1 %v2158_v2  ;;  %1766 = vmatprep.subr.bf16.mxu0 %v1992_v0  ;;  %v95_v5 = vld [vmem:[%s2550_s10] sm:$0x1f]  ;;  %s2556_s8 = sld [smem:[#allocation11_spill]] }
  0x15   :  { %1774 = vmatprep.subr.bf16.mxu1 %v1992_v0  ;;  %v118_v6 = vpack.c.bf16 %v95_v5, %v95_v5  ;;  %v2181_v7 = vld [vmem:[%s2551_s27 + $0x8] sm:$0xff]   ;;  %v2197_v9 = vld [vmem:[%s2551_s27] sm:$0xff]   ;;  %333 = vst.msk [vmem:[#allocation2] sm:$0x1f] %vm332_vm2, %v95_v5  ;;  %s2557_s0 = sld [smem:[#allocation12_spill]] }
  0x16   :  { %v2188_v8 = vld [vmem:[%s2552_s28 + $0x8] sm:$0xff]   ;;  %v2204_v10 = vld [vmem:[%s2552_s28] sm:$0xff]   ;;  %s2558_s10 = sld [smem:[#allocation13_spill]] }
  0x17   :  { %1767 = vmatpush3.bf16.msra.mxu0 %v1961_v3  ;;  %v346_v38 = vld [vmem:[%s2553_s1] sm:$0xf] }
  0x18   :  { %1775 = vmatpush3.bf16.msra.mxu1 %v2172_v4  ;;  %1780 = vmatprep.subr.bf16.mxu0 %v1992_v0  ;;  %v112_v54 = vld [vmem:[%s2554_s6] sm:$0xff] }
  0x19   :  { %1788 = vmatprep.subr.bf16.mxu1 %v1992_v0  ;;  %v113_v57 = vld [vmem:[%s2555_s3] sm:$0xff] }
  0x1a   :  { %1769 = vmatmul.mubr.msk.bf16.vlgmr.msra.gmra.mxu0 %vm84_vm0, %v118_v6 }
  0x1b   :  { %1777 = vmatmul.mubr.msk.bf16.vlgmr.msra.gmra.mxu1 %vm84_vm0, %v118_v6  ;;  %1781 = vmatpush3.bf16.msra.mxu0 %v2181_v7 }
  0x1c   :  { %1789 = vmatpush3.bf16.msra.mxu1 %v2188_v8  ;;  %1782 = vmatprep.subr.bf16.mxu0 %v1992_v0  ;;  %v338_v35 = vld [vmem:[#allocation2] sm:$0xff] }
  0x1d   :  { %1790 = vmatprep.subr.bf16.mxu1 %v1992_v0  ;;  %1784 = vmatprep.mubr.msk.bf16.mxu0 %vm1993_vm1, %v1992_v0 }
  0x1e   :  { %1792 = vmatprep.mubr.msk.bf16.mxu1 %vm1993_vm1, %v1992_v0 }
  0x1f   :  { %1783 = vmatpush3.bf16.msra.mxu0 %v2197_v9 }
  0x20   :  { %1791 = vmatpush3.bf16.msra.mxu1 %v2204_v10  ;;  %1796 = vmatprep.subr.bf16.mxu0 %v1992_v0 }
  0x21   :  { %1806 = vmatprep.subr.bf16.mxu1 %v1992_v0 }
  0x22   :  { %1785 = vmatmul.mubr.msk.bf16.vlgmr.msra.gmra.mxu0 %vm84_vm0, %v118_v6 }
  0x23   :  { %1793 = vmatmul.mubr.msk.bf16.vlgmr.msra.gmra.mxu1 %vm84_vm0, %v118_v6  ;;  %1802 = vmatprep.mubr.msk.bf16.mxu0 %vm1993_vm1, %v1992_v0 }
  0x24   :  { %1807 = vmatpush3.bf16.msra.mxu1 %v1959_v1  ;;  %1810 = vmatprep.mubr.msk.bf16.mxu1 %vm1993_vm1, %v1992_v0 }
  0x25   :  { %1808 = vmatprep.subr.bf16.mxu1 %v1992_v0 }
  0x28   :  { %1809 = vmatpush3.bf16.msra.mxu1 %v1961_v3 }
  0x29   :  { %1814 = vmatprep.subr.bf16.mxu1 %v1992_v0 }
  0xda   :  { %v168_v11 = vpop.f32.mrf.mxu0 }
  0xdb   :  { %334 = vst.msk [vmem:[#allocation2 + $0x8] sm:$0x1f] %vm332_vm2, %v168_v11  ;;  %v220_v12 = vpop.f32.mrf.mxu1 }
  0xdc   :  { %335 = vst.msk [vmem:[#allocation2 + $0x10] sm:$0x1f] %vm332_vm2, %v220_v12  ;;  %v1770_v13 = vpop.f32.mrf.mxu0 }
  0xdd   :  { %v1778_v14 = vpop.f32.mrf.mxu1 }
  0xde   :  { %v171_v15 = vpop.f32.mrf.mxu0 }
  0xdf   :  { %v223_v16 = vpop.f32.mrf.mxu1 }
  0xe0   :  { %v1771_v17 = vpop.f32.mrf.mxu0 }
  0xe1   :  { %v1779_v18 = vpop.f32.mrf.mxu1 }
  0xe2   :  { %v272_v19 = vpop.f32.mrf.mxu0  ;;  %v339_v36 = vld [vmem:[#allocation2 + $0x8] sm:$0xff] }
  0xe3   :  { %v278_v20 = vand.u32 2147483647, %v272_v19  ;;  %v325_v21 = vpop.f32.mrf.mxu1  ;;  %v340_v33 = vld [vmem:[#allocation2 + $0x10] sm:$0xff]  ;;  %v343_v37 = vpack.c.bf16 %v339_v36, %v338_v35 }
  0xe4   :  { %v331_v22 = vand.u32 2147483647, %v325_v21  ;;  %v1786_v23 = vpop.f32.mrf.mxu0 }
  0xe5   :  { %336 = vst.msk [vmem:[#allocation2 + $0x18] sm:$0x1f] %vm332_vm2, %v278_v20  ;;  %v1794_v24 = vpop.f32.mrf.mxu1 }
  0xe6   :  { %337 = vst.msk [vmem:[#allocation2 + $0x20] sm:$0x1f] %vm332_vm2, %v331_v22  ;;  %v275_v25 = vpop.f32.mrf.mxu0 }
  0xe7   :  { %v328_v26 = vpop.f32.mrf.mxu1 }
  0xe8   :  { %v1787_v27 = vpop.f32.mrf.mxu0 }
  0xe9   :  { %v1795_v28 = vpop.f32.mrf.mxu1  ;;  %v601_v27 = vld [vmem:[%s2556_s8] sm:$0xf] }
  0xea   :  { %v1967_v28 = vld [vmem:[%s2557_s0 + $0x8] sm:$0xff]  }
  0xec   :  { %v341_v32 = vld [vmem:[#allocation2 + $0x18] sm:$0xff] }
  0xed   :  { %v342_v29 = vld [vmem:[#allocation2 + $0x20] sm:$0xff]  ;;  %v344_v34 = vpack.c.bf16 %v341_v32, %v340_v33 }
  0xee   :  { %v345_v30 = vpack.c.bf16 %v342_v29, %v342_v29  ;;  %v1968_v29 = vld [vmem:[%s2557_s0] sm:$0xff]  }
  0xf0   :  { %v353_v31 = vsel %vm351_vm3, %v345_v30, 0 }
  0xf1   :  { %1797 = vmatpush3.bf16.msra.mxu0 %v353_v31 }
  0xf2   :  { %1798 = vmatprep.subr.bf16.mxu0 %v1992_v0 }
  0xf5   :  { %1799 = vmatpush3.bf16.msra.mxu0 %v344_v34 }
  0xf6   :  { %1800 = vmatprep.subr.bf16.mxu0 %v1992_v0 }
  0xf9   :  { %1801 = vmatpush3.bf16.msra.mxu0 %v343_v37  ;;  %v1969_v37 = vld [vmem:[%s2558_s10] sm:$0xff]  }
  0xfa   :  { %1822 = vmatprep.subr.bf16.mxu0 %v1992_v0 }
  0xfc   :  { %1803 = vmatmul.mubr.msk.bf16.vlgmr.msra.gmra.mxu0 %vm347_vm4, %v346_v38  ;;  %v2306_v38 = vld [vmem:[%s2516_s11] sm:$0xff]  }
  0xfd   :  { %1823 = vmatpush3.bf16.msra.mxu0 %v2181_v7  ;;  %1826 = vmatprep.mubr.msk.bf16.mxu0 %vm1993_vm1, %v1992_v0 }
  0xfe   :  { %1824 = vmatprep.subr.bf16.mxu0 %v1992_v0 }
 0x101   :  { %1825 = vmatpush3.bf16.msra.mxu0 %v2197_v9 }
 0x102   :  { %1838 = vmatprep.subr.bf16.mxu0 %v1992_v0 }
 0x1bc   :  { %v2242_v39 = vpop.f32.mrf.mxu0 }
 0x1bd   :  { %v395_v40 = vmax.f32 %v2242_v39, 0.0 }
 0x1be   :  { %v1804_v41 = vpop.f32.mrf.mxu0 }
 0x1bf   :  { %v396_v42 = vsel %vm84_vm0, %v395_v40, 0.0  ;;  %v2317_v41 = vld [vmem:[%s2518_s13] sm:$0xff]  }
 0x1c0   :  { %397 = vadd.xlane.f32.xlu0 %v396_v42  ;;  %v392_v43 = vpop.f32.mrf.mxu0 }
 0x1c2   :  { %v1805_v44 = vpop.f32.mrf.mxu0 }
 0x249   :  { %v398_v45 = vpop.xlane.xlu0 %397 }
 0x24a   :  { %v400_v46 = vmul.f32 0.03125, %v398_v45 }
 0x24c   :  { %v401_v47 = vsub.f32 %v395_v40, %v400_v46  ;;  %v1971_v40 = vld [vmem:[%s2517_s12] sm:$0xff]  }
 0x24e   :  { %v402_v48 = vmul.f32 %v401_v47, %v401_v47 }
 0x250   :  { %v403_v49 = vsel %vm84_vm0, %v402_v48, 0.0 }
 0x251   :  { %404 = vadd.xlane.f32.xlu0 %v403_v49 }
 0x2da   :  { %v405_v51 = vpop.xlane.xlu0 %404 }
 0x2db   :  { %v406_v52 = vmul.f32 0.03125, %v405_v51 }
 0x2dd   :  { %v407_v53 = vadd.f32 1e-05, %v406_v52 }
 0x2df   :  { %1978 = vrsqrt.f32 %v407_v53 }
 0x2ec   :  { %v1979_v55 = vpop.eup %1978 }
 0x2ed   :  { %v409_v56 = vmul.f32 %v1979_v55, %v112_v54 }
 0x2ef   :  { %412 = vperm.xlu1 %1957, %v409_v56  }
 0x2f3   :  { %418 = vperm.xlu1 %1957, %v113_v57  }
 0x36a   :  { %v413_v58 = vpop.permute.xlu1 %412 }
 0x36b   :  { %v415_v59 = vmul.f32 %v413_v58, %v401_v47 }
 0x36e   :  { %v419_v60 = vpop.permute.xlu1 %418 }
 0x36f   :  { %v421_v61 = vadd.f32 %v419_v60, %v415_v59 }
 0x371   :  { %v422_v62 = vpack.c.bf16 %v421_v61, %v421_v61  ;;  %588 = vst.msk [vmem:[#allocation2] sm:$0xff] %vm84_vm0, %v421_v61 }
 0x373   :  { %1811 = vmatmul.mubr.msk.bf16.vlgmr.msra.gmra.mxu1 %vm84_vm0, %v422_v62  ;;  %1827 = vmatmul.mubr.msk.bf16.vlgmr.msra.gmra.mxu0 %vm84_vm0, %v422_v62 }
 0x374   :  { %1815 = vmatpush3.bf16.msra.mxu1 %v2158_v2  ;;  %1818 = vmatprep.mubr.msk.bf16.mxu1 %vm1993_vm1, %v1992_v0 }
 0x375   :  { %1816 = vmatprep.subr.bf16.mxu1 %v1992_v0  ;;  %1844 = vmatprep.mubr.msk.bf16.mxu0 %vm1993_vm1, %v1992_v0 }
 0x378   :  { %1817 = vmatpush3.bf16.msra.mxu1 %v2172_v4  ;;  %v593_v25 = vld [vmem:[#allocation2] sm:$0xff] }
 0x379   :  { %1830 = vmatprep.subr.bf16.mxu1 %v1992_v0 }
 0x37b   :  { %1819 = vmatmul.mubr.msk.bf16.vlgmr.msra.gmra.mxu1 %vm84_vm0, %v422_v62 }
 0x37c   :  { %1831 = vmatpush3.bf16.msra.mxu1 %v2188_v8  ;;  %1834 = vmatprep.mubr.msk.bf16.mxu1 %vm1993_vm1, %v1992_v0 }
 0x37d   :  { %1832 = vmatprep.subr.bf16.mxu1 %v1992_v0 }
 0x380   :  { %1833 = vmatpush3.bf16.msra.mxu1 %v2204_v10 }
 0x381   :  { %1848 = vmatprep.subr.bf16.mxu1 %v1992_v0 }
 0x383   :  { %1835 = vmatmul.mubr.msk.bf16.vlgmr.msra.gmra.mxu1 %vm84_vm0, %v422_v62 }
 0x384   :  { %1852 = vmatprep.mubr.msk.bf16.mxu1 %vm1993_vm1, %v1992_v0  ;;  %1849 = vmatpush3.bf16.msra.mxu1 %v1967_v28 }
 0x385   :  { %1850 = vmatprep.subr.bf16.mxu1 %v1992_v0 }
 0x388   :  { %1851 = vmatpush3.bf16.msra.mxu1 %v1968_v29 }
 0x389   :  { %1862 = vmatprep.subr.bf16.mxu1 %v1992_v0 }
 0x433   :  { %v460_v63 = vpop.f32.mrf.mxu1  ;;  %v540_v1 = vpop.f32.mrf.mxu0 }
 0x434   :  { %589 = vst.msk [vmem:[#allocation2 + $0x8] sm:$0xff] %vm84_vm0, %v460_v63  ;;  %v546_v2 = vand.u32 2147483647, %v540_v1 }
 0x435   :  { %v1812_v3 = vpop.f32.mrf.mxu1  ;;  %v1828_v4 = vpop.f32.mrf.mxu0 }
 0x436   :  { %591 = vst.msk [vmem:[#allocation2 + $0x18] sm:$0xff] %vm84_vm0, %v546_v2 }
 0x437   :  { %v463_v5 = vpop.f32.mrf.mxu1  ;;  %v543_v6 = vpop.f32.mrf.mxu0 }
 0x439   :  { %v1813_v7 = vpop.f32.mrf.mxu1  ;;  %v1829_v8 = vpop.f32.mrf.mxu0 }
 0x43b   :  { %v500_v9 = vpop.f32.mrf.mxu1  ;;  %v594_v24 = vld [vmem:[#allocation2 + $0x8] sm:$0xff] }
 0x43c   :  { %590 = vst.msk [vmem:[#allocation2 + $0x10] sm:$0xff] %vm84_vm0, %v500_v9  ;;  %v598_v26 = vpack.c.bf16 %v594_v24, %v593_v25 }
 0x43d   :  { %v1820_v10 = vpop.f32.mrf.mxu1  ;;  %v596_v22 = vld [vmem:[#allocation2 + $0x18] sm:$0xff] }
 0x43e   :  { %v1973_v10 = vld [vmem:[%s2519_s14] sm:$0xff]  }
 0x43f   :  { %v503_v11 = vpop.f32.mrf.mxu1 }
 0x441   :  { %v1821_v12 = vpop.f32.mrf.mxu1 }
 0x443   :  { %v581_v13 = vpop.f32.mrf.mxu1  ;;  %v595_v21 = vld [vmem:[#allocation2 + $0x10] sm:$0xff] }
 0x444   :  { %v587_v14 = vand.u32 2147483647, %v581_v13  ;;  %v599_v23 = vpack.c.bf16 %v596_v22, %v595_v21 }
 0x445   :  { %v1836_v15 = vpop.f32.mrf.mxu1 }
 0x446   :  { %592 = vst.msk [vmem:[#allocation2 + $0x20] sm:$0xff] %vm84_vm0, %v587_v14 }
 0x447   :  { %v584_v16 = vpop.f32.mrf.mxu1 }
 0x449   :  { %v1837_v17 = vpop.f32.mrf.mxu1 }
 0x44d   :  { %v597_v18 = vld [vmem:[#allocation2 + $0x20] sm:$0xff] }
 0x44e   :  { %v600_v19 = vpack.c.bf16 %v597_v18, %v597_v18 }
 0x450   :  { %v606_v20 = vsel %vm351_vm3, %v600_v19, 0 }
 0x451   :  { %1839 = vmatpush3.bf16.msra.mxu0 %v606_v20 }
 0x452   :  { %1840 = vmatprep.subr.bf16.mxu0 %v1992_v0 }
 0x455   :  { %1841 = vmatpush3.bf16.msra.mxu0 %v599_v23 }
 0x456   :  { %1842 = vmatprep.subr.bf16.mxu0 %v1992_v0 }
 0x459   :  { %1843 = vmatpush3.bf16.msra.mxu0 %v598_v26 }
 0x45a   :  { %1856 = vmatprep.subr.bf16.mxu0 %v1992_v0 }
 0x45c   :  { %1845 = vmatmul.mubr.msk.bf16.vlgmr.msra.gmra.mxu0 %vm347_vm4, %v601_v27 }
 0x45d   :  { %1858 = vmatprep.mubr.msk.bf16.mxu0 %vm1993_vm1, %v1992_v0  ;;  %1857 = vmatpush3.bf16.msra.mxu0 %v1969_v37 }
 0x45e   :  { %1868 = vmatprep.subr.bf16.mxu0 %v1992_v0 }
 0x51c   :  { %v642_v30 = vpop.f32.mrf.mxu0 }
 0x51d   :  { %v643_v31 = vadd.f32 %v642_v30, %v2242_v39 }
 0x51e   :  { %v1846_v32 = vpop.f32.mrf.mxu0 }
 0x51f   :  { %v648_v33 = vmax.f32 %v643_v31, 0.0 }
 0x520   :  { %v645_v34 = vpop.f32.mrf.mxu0 }
 0x521   :  { %v649_v35 = vpack.c.bf16 %v648_v33, %v648_v33 }
 0x522   :  { %v1847_v36 = vpop.f32.mrf.mxu0 }
 0x523   :  { %1853 = vmatmul.mubr.msk.bf16.vlgmr.msra.gmra.mxu1 %vm84_vm0, %v649_v35  ;;  %v713_v35 = vld [vmem:[%s2520_s15] sm:$0xff] }
 0x524   :  { %1864 = vmatprep.mubr.msk.bf16.mxu1 %vm1993_vm1, %v1992_v0  ;;  %1863 = vmatpush3.bf16.msra.mxu1 %v2306_v38 }
 0x525   :  { %1874 = vmatprep.subr.bf16.mxu1 %v1992_v0 }
 0x5e3   :  { %v699_v39 = vpop.f32.mrf.mxu1 }
 0x5e4   :  { %v719_v42 = vpack.c.bf16 %v699_v39, %v699_v39  ;;  %910 = vst.msk [vmem:[#allocation2] sm:$0xff] %vm726_vm5, %v699_v39  ;;  %v714_v39 = vld [vmem:[%s2520_s15 + $0x8] sm:$0xff] }
 0x5e5   :  { %v1854_v43 = vpop.f32.mrf.mxu1 }
 0x5e6   :  { %1859 = vmatmul.mubr.msk.bf16.vlgmr.msra.gmra.mxu0 %vm726_vm5, %v719_v42  ;;  %1865 = vmatmul.mubr.msk.bf16.vlgmr.msra.gmra.mxu1 %vm726_vm5, %v719_v42 }
 0x5e7   :  { %v702_v44 = vpop.f32.mrf.mxu1  ;;  %1869 = vmatpush3.bf16.msra.mxu0 %v1971_v40  ;;  %1875 = vmatpush3.bf16.msra.mxu1 %v2317_v41 }
 0x5e8   :  { %1870 = vmatprep.mubr.msk.bf16.mxu0 %vm1993_vm1, %v1992_v0  ;;  %1876 = vmatprep.mubr.msk.bf16.mxu1 %vm1993_vm1, %v1992_v0  ;;  %v1389_v44 = vld [vmem:[%s2522_s21 + $0x18] sm:$0xff] }
 0x5e9   :  { %v1855_v45 = vpop.f32.mrf.mxu1  ;;  %1880 = vmatprep.subr.bf16.mxu0 %v1992_v0  ;;  %1890 = vmatprep.subr.bf16.mxu1 %v1992_v0 }
 0x5ea   :  { %v715_v45 = vld [vmem:[%s2521_s16] sm:$0xff] }
 0x5eb   :  { %v915_v8 = vld [vmem:[#allocation2] sm:$0xff] }
 0x5ee   :  { %1871 = vmatmul.mubr.msk.bf16.vlgmr.msra.gmra.mxu0 %vm726_vm5, %v719_v42  ;;  %1877 = vmatmul.mubr.msk.bf16.vlgmr.msra.gmra.mxu1 %vm726_vm5, %v719_v42  ;;  %v716_v42 = vld [vmem:[%s2521_s16 + $0x8] sm:$0xff] }
 0x5ef   :  { %1886 = vmatprep.mubr.msk.bf16.mxu0 %vm1993_vm1, %v1992_v0  ;;  %1891 = vmatpush3.bf16.msra.mxu1 %v1969_v37 }
 0x5f0   :  { %1892 = vmatprep.mubr.msk.bf16.mxu1 %vm1993_vm1, %v1992_v0  ;;  %1896 = vmatprep.subr.bf16.mxu1 %v1992_v0 }
 0x6a6   :  { %v764_v46 = vpop.f32.mrf.mxu0  ;;  %v810_v47 = vpop.f32.mrf.mxu1 }
 0x6a7   :  { %911 = vst.msk [vmem:[#allocation2 + $0x8] sm:$0xff] %vm726_vm5, %v764_v46  ;;  %912 = vst.msk [vmem:[#allocation2 + $0x10] sm:$0xff] %vm726_vm5, %v810_v47  ;;  %v1387_v46 = vld [vmem:[%s2522_s21 + $0x8] sm:$0xff]  ;;  %v1388_v47 = vld [vmem:[%s2522_s21 + $0x10] sm:$0xff] }
 0x6a8   :  { %v1860_v48 = vpop.f32.mrf.mxu0  ;;  %v1866_v49 = vpop.f32.mrf.mxu1 }
 0x6a9   :  { %v1386_v48 = vld [vmem:[%s2522_s21] sm:$0xff] }
 0x6aa   :  { %v767_v50 = vpop.f32.mrf.mxu0  ;;  %v813_v51 = vpop.f32.mrf.mxu1 }
 0x6ac   :  { %v1861_v52 = vpop.f32.mrf.mxu0  ;;  %v1867_v53 = vpop.f32.mrf.mxu1 }
 0x6ae   :  { %v856_v54 = vpop.f32.mrf.mxu0  ;;  %v903_v55 = vpop.f32.mrf.mxu1  ;;  %v917_v5 = vld [vmem:[#allocation2 + $0x10] sm:$0xff]  ;;  %v916_v7 = vld [vmem:[#allocation2 + $0x8] sm:$0xff] }
 0x6af   :  { %v862_v56 = vand.u32 2147483647, %v856_v54  ;;  %v909_v57 = vand.u32 2147483647, %v903_v55  ;;  %v920_v9 = vpack.c.bf16 %v916_v7, %v915_v8 }
 0x6b0   :  { %v1872_v58 = vpop.f32.mrf.mxu0  ;;  %v1878_v59 = vpop.f32.mrf.mxu1 }
 0x6b1   :  { %913 = vst.msk [vmem:[#allocation2 + $0x18] sm:$0xff] %vm726_vm5, %v862_v56  ;;  %914 = vst.msk [vmem:[#allocation2 + $0x20] sm:$0xff] %vm726_vm5, %v909_v57 }
 0x6b2   :  { %v859_v60 = vpop.f32.mrf.mxu0  ;;  %v906_v61 = vpop.f32.mrf.mxu1 }
 0x6b4   :  { %v1873_v62 = vpop.f32.mrf.mxu0  ;;  %v1879_v63 = vpop.f32.mrf.mxu1 }
 0x6b8   :  { %v919_v1 = vld [vmem:[#allocation2 + $0x20] sm:$0xff]  ;;  %v918_v4 = vld [vmem:[#allocation2 + $0x18] sm:$0xff] }
 0x6b9   :  { %v922_v2 = vpack.c.bf16 %v919_v1, %v919_v1  ;;  %v921_v6 = vpack.c.bf16 %v918_v4, %v917_v5 }
 0x6bb   :  { %v934_v3 = vsel %vm351_vm3, %v922_v2, 0 }
 0x6bc   :  { %1881 = vmatpush3.bf16.msra.mxu0 %v934_v3 }
 0x6bd   :  { %1882 = vmatprep.subr.bf16.mxu0 %v1992_v0 }
 0x6c0   :  { %1883 = vmatpush3.bf16.msra.mxu0 %v921_v6 }
 0x6c1   :  { %1884 = vmatprep.subr.bf16.mxu0 %v1992_v0 }
 0x6c4   :  { %1885 = vmatpush3.bf16.msra.mxu0 %v920_v9 }
 0x6c5   :  { %1902 = vmatprep.subr.bf16.mxu0 %v1992_v0 }
 0x6c7   :  { %1887 = vmatmul.mubr.msk.bf16.vlgmr.msra.gmra.mxu0 %vm347_vm4, %v1973_v10 }
 0x6c8   :  { %1903 = vmatpush3.bf16.msra.mxu0 %v1971_v40  ;;  %1904 = vmatprep.mubr.msk.bf16.mxu0 %vm1993_vm1, %v1992_v0 }
 0x6c9   :  { %1914 = vmatprep.subr.bf16.mxu0 %v1992_v0 }
 0x787   :  { %v2351_v11 = vpop.f32.mrf.mxu0 }
 0x788   :  { %v977_v12 = vmax.f32 %v2351_v11, 0.0 }
 0x789   :  { %v1888_v13 = vpop.f32.mrf.mxu0 }
 0x78a   :  { %v979_v14 = vsel %vm726_vm5, %v977_v12, 0.0 }
 0x78b   :  { %980 = vadd.xlane.f32.xlu0 %v979_v14  ;;  %v2355_v15 = vpop.f32.mrf.mxu0 }
 0x78c   :  { %v978_v16 = vmax.f32 %v2355_v15, 0.0 }
 0x78d   :  { %v1889_v17 = vpop.f32.mrf.mxu0 }
 0x78e   :  { %v982_v18 = vsel %vm726_vm5, %v978_v16, 0.0 }
 0x78f   :  { %983 = vadd.xlane.f32.xlu1 %v982_v18 }
 0x814   :  { %v981_v19 = vpop.xlane.xlu0 %980 }
 0x815   :  { %v986_v20 = vmul.f32 0.0625, %v981_v19 }
 0x817   :  { %v988_v21 = vsub.f32 %v977_v12, %v986_v20 }
 0x818   :  { %v984_v22 = vpop.xlane.xlu1 %983 }
 0x819   :  { %v987_v23 = vmul.f32 0.0625, %v984_v22  ;;  %v990_v24 = vmul.f32 %v988_v21, %v988_v21 }
 0x81b   :  { %v989_v25 = vsub.f32 %v978_v16, %v987_v23  ;;  %v992_v26 = vsel %vm726_vm5, %v990_v24, 0.0 }
 0x81c   :  { %993 = vadd.xlane.f32.xlu0 %v992_v26 }
 0x81d   :  { %v991_v27 = vmul.f32 %v989_v25, %v989_v25 }
 0x81f   :  { %v995_v28 = vsel %vm726_vm5, %v991_v27, 0.0 }
 0x820   :  { %996 = vadd.xlane.f32.xlu0 %v995_v28 }
 0x8a5   :  { %v994_v29 = vpop.xlane.xlu0 %993 }
 0x8a6   :  { %v998_v30 = vmul.f32 0.0625, %v994_v29 }
 0x8a8   :  { %v1000_v31 = vadd.f32 1e-05, %v998_v30  ;;  %v1974_v30 = vld [vmem:[%s2523_s17] sm:$0xff]  }
 0x8a9   :  { %v997_v32 = vpop.xlane.xlu0 %996 }
 0x8aa   :  { %1980 = vrsqrt.f32 %v1000_v31  ;;  %v999_v33 = vmul.f32 0.0625, %v997_v32  ;;  %v1975_v31 = vld [vmem:[%s2524_s18] sm:$0xff]  }
 0x8ac   :  { %v1001_v34 = vadd.f32 1e-05, %v999_v33 }
 0x8ae   :  { %1982 = vrsqrt.f32 %v1001_v34 }
 0x8b7   :  { %v1981_v36 = vpop.eup %1980 }
 0x8b8   :  { %v1004_v37 = vmul.f32 %v1981_v36, %v713_v35 }
 0x8ba   :  { %1008 = vperm.xlu0 %1958, %v1004_v37  }
 0x8bb   :  { %v1983_v40 = vpop.eup %1982 }
 0x8bc   :  { %v1005_v43 = vmul.f32 %v1983_v40, %v714_v39 }
 0x8be   :  { %1025 = vperm.xlu0 %1958, %v716_v42   ;;  %1013 = vperm.xlu1 %1957, %v1005_v43   ;;  %v1332_v43 = vld [vmem:[%s2525_s19] sm:$0xf] }
 0x8c2   :  { %1416 = vperm.xlu0 %1958, %v1389_v44   ;;  %1020 = vperm.xlu1 %1957, %v715_v45   ;;  %v1339_v44 = vsel %vm351_vm3, %v1332_v43, 0 }
 0x8c6   :  { %1406 = vperm.xlu0 %1958, %v1387_v46   ;;  %1411 = vperm.xlu1 %1957, %v1388_v47  }
 0x8ca   :  { %1401 = vperm.xlu1 %1957, %v1386_v48   ;;  %v1976_v48 = vld [vmem:[%s2526_s20] sm:$0xff]  }
 0x935   :  { %v1009_v49 = vpop.permute.xlu0 %1008 }
 0x936   :  { %v1016_v53 = vmul.f32 %v1009_v49, %v988_v21 }
 0x939   :  { %v1014_v50 = vpop.permute.xlu1 %1013  ;;  %v1026_v52 = vpop.permute.xlu0 %1025 }
 0x93a   :  { %v1017_v51 = vmul.f32 %v1014_v50, %v989_v25 }
 0x93c   :  { %v1029_v54 = vadd.f32 %v1026_v52, %v1017_v51 }
 0x93d   :  { %v1021_v55 = vpop.permute.xlu1 %1020 }
 0x93e   :  { %1203 = vst.msk [vmem:[#allocation2 + $0x8] sm:$0xff] %vm726_vm5, %v1029_v54  ;;  %v1028_v56 = vadd.f32 %v1021_v55, %v1016_v53  ;;  %v1417_v55 = vpop.permute.xlu0 %1416 }
 0x940   :  { %v1030_v57 = vpack.c.bf16 %v1029_v54, %v1028_v56  ;;  %1202 = vst.msk [vmem:[#allocation2] sm:$0xff] %vm726_vm5, %v1028_v56  ;;  %v1977_v54 = vld [vmem:[%s2526_s20 + $0x8] sm:$0xff]  }
 0x941   :  { %v1412_v56 = vpop.permute.xlu1 %1411 }
 0x942   :  { %1893 = vmatmul.mubr.msk.bf16.vlgmr.msra.gmra.mxu1 %vm726_vm5, %v1030_v57  ;;  %1905 = vmatmul.mubr.msk.bf16.vlgmr.msra.gmra.mxu0 %vm726_vm5, %v1030_v57 }
 0x943   :  { %1897 = vmatpush3.bf16.msra.mxu1 %v2306_v38  ;;  %1898 = vmatprep.mubr.msk.bf16.mxu1 %vm1993_vm1, %v1992_v0 }
 0x944   :  { %1908 = vmatprep.subr.bf16.mxu1 %v1992_v0  ;;  %1924 = vmatprep.mubr.msk.bf16.mxu0 %vm1993_vm1, %v1992_v0 }
 0x945   :  { %v1213_v28 = vld [vmem:[#allocation2 + $0x8] sm:$0xff] }
 0x947   :  { %v1212_v27 = vld [vmem:[#allocation2] sm:$0xff] }
 0x948   :  { %v1222_v29 = vpack.c.bf16 %v1213_v28, %v1212_v27  ;;  %v1396_v28 = vld [vmem:[%s2527_s23 + $0x10] sm:$0xff] }
 0x94a   :  { %1899 = vmatmul.mubr.msk.bf16.vlgmr.msra.gmra.mxu1 %vm726_vm5, %v1030_v57 }
 0x94b   :  { %1909 = vmatpush3.bf16.msra.mxu1 %v2317_v41  ;;  %1910 = vmatprep.mubr.msk.bf16.mxu1 %vm1993_vm1, %v1992_v0 }
 0x94c   :  { %1928 = vmatprep.subr.bf16.mxu1 %v1992_v0 }
 0x952   :  { %1911 = vmatmul.mubr.msk.bf16.vlgmr.msra.gmra.mxu1 %vm726_vm5, %v1030_v57 }
 0x953   :  { %1930 = vmatprep.mubr.msk.bf16.mxu1 %vm1993_vm1, %v1992_v0  ;;  %1929 = vmatpush3.bf16.msra.mxu1 %v1975_v31 }
 0x954   :  { %1934 = vmatprep.subr.bf16.mxu1 %v1992_v0 }
 0xa02   :  { %v1068_v38 = vpop.f32.mrf.mxu1  ;;  %v1150_v58 = vpop.f32.mrf.mxu0 }
 0xa03   :  { %1204 = vst.msk [vmem:[#allocation2 + $0x10] sm:$0xff] %vm726_vm5, %v1068_v38  ;;  %v1157_v59 = vand.u32 2147483647, %v1150_v58 }
 0xa04   :  { %v1894_v60 = vpop.f32.mrf.mxu1  ;;  %v1906_v61 = vpop.f32.mrf.mxu0 }
 0xa05   :  { %1208 = vst.msk [vmem:[#allocation2 + $0x30] sm:$0xff] %vm726_vm5, %v1157_v59  ;;  %v1407_v61 = vpop.permute.xlu0 %1406 }
 0xa06   :  { %v1071_v41 = vpop.f32.mrf.mxu1  ;;  %v1153_v62 = vpop.f32.mrf.mxu0 }
 0xa07   :  { %1205 = vst.msk [vmem:[#allocation2 + $0x18] sm:$0xff] %vm726_vm5, %v1071_v41  ;;  %v1158_v63 = vand.u32 2147483647, %v1153_v62  ;;  %v1402_v62 = vpop.permute.xlu1 %1401 }
 0xa08   :  { %v1895_v1 = vpop.f32.mrf.mxu1  ;;  %v1907_v2 = vpop.f32.mrf.mxu0 }
 0xa09   :  { %1209 = vst.msk [vmem:[#allocation2 + $0x38] sm:$0xff] %vm726_vm5, %v1158_v63 }
 0xa0a   :  { %v1109_v3 = vpop.f32.mrf.mxu1  ;;  %v1214_v25 = vld [vmem:[#allocation2 + $0x10] sm:$0xff] }
 0xa0b   :  { %1206 = vst.msk [vmem:[#allocation2 + $0x20] sm:$0xff] %vm726_vm5, %v1109_v3 }
 0xa0c   :  { %v1900_v4 = vpop.f32.mrf.mxu1  ;;  %v1218_v19 = vld [vmem:[#allocation2 + $0x30] sm:$0xff] }
 0xa0e   :  { %v1112_v5 = vpop.f32.mrf.mxu1  ;;  %v1215_v24 = vld [vmem:[#allocation2 + $0x18] sm:$0xff] }
 0xa0f   :  { %1207 = vst.msk [vmem:[#allocation2 + $0x28] sm:$0xff] %vm726_vm5, %v1112_v5  ;;  %v1223_v26 = vpack.c.bf16 %v1215_v24, %v1214_v25 }
 0xa10   :  { %v1901_v6 = vpop.f32.mrf.mxu1  ;;  %v1219_v18 = vld [vmem:[#allocation2 + $0x38] sm:$0xff] }
 0xa11   :  { %v1225_v20 = vpack.c.bf16 %v1219_v18, %v1218_v19 }
 0xa12   :  { %v1193_v7 = vpop.f32.mrf.mxu1  ;;  %v1216_v22 = vld [vmem:[#allocation2 + $0x20] sm:$0xff] }
 0xa13   :  { %v1200_v8 = vand.u32 2147483647, %v1193_v7 }
 0xa14   :  { %v1912_v9 = vpop.f32.mrf.mxu1 }
 0xa15   :  { %1210 = vst.msk [vmem:[#allocation2 + $0x40] sm:$0xff] %vm726_vm5, %v1200_v8 }
 0xa16   :  { %v1196_v10 = vpop.f32.mrf.mxu1  ;;  %v1217_v21 = vld [vmem:[#allocation2 + $0x28] sm:$0xff] }
 0xa17   :  { %v1201_v12 = vand.u32 2147483647, %v1196_v10  ;;  %v1224_v23 = vpack.c.bf16 %v1217_v21, %v1216_v22 }
 0xa18   :  { %v1913_v13 = vpop.f32.mrf.mxu1 }
 0xa19   :  { %1211 = vst.msk [vmem:[#allocation2 + $0x48] sm:$0xff] %vm726_vm5, %v1201_v12 }
 0xa1c   :  { %v1220_v14 = vld [vmem:[#allocation2 + $0x40] sm:$0xff] }
 0xa20   :  { %v1221_v16 = vld [vmem:[#allocation2 + $0x48] sm:$0xff] }
 0xa21   :  { %v1226_v17 = vpack.c.bf16 %v1221_v16, %v1220_v14 }
 0xa23   :  { %1915 = vmatpush3.bf16.msra.mxu0 %v1226_v17 }
 0xa24   :  { %1916 = vmatprep.subr.bf16.mxu0 %v1992_v0 }
 0xa27   :  { %1917 = vmatpush3.bf16.msra.mxu0 %v1225_v20 }
 0xa28   :  { %1918 = vmatprep.subr.bf16.mxu0 %v1992_v0 }
 0xa2b   :  { %1919 = vmatpush3.bf16.msra.mxu0 %v1224_v23 }
 0xa2c   :  { %1920 = vmatprep.subr.bf16.mxu0 %v1992_v0 }
 0xa2f   :  { %1921 = vmatpush3.bf16.msra.mxu0 %v1223_v26 }
 0xa30   :  { %1922 = vmatprep.subr.bf16.mxu0 %v1992_v0 }
 0xa33   :  { %1923 = vmatpush3.bf16.msra.mxu0 %v1222_v29  ;;  %v1397_v29 = vld [vmem:[%s2527_s23 + $0x18] sm:$0xff] }
 0xa36   :  { %1925 = vmatmul.mubr.msk.bf16.vlgmr.msra.gmra.mxu0 %vm1234_vm6, %v1974_v30 }
 0xa37   :  { %1942 = vmatprep.mubr.msk.bf16.mxu0 %vm726_vm5, %v1976_v48  ;;  %v1391_v48 = vld [vmem:[%s2528_s22 + $0x8] sm:$0xff] }
 0xaf6   :  { %v1272_v32 = vpop.f32.mrf.mxu0 }
 0xaf7   :  { %v1273_v34 = vadd.f32 %v1272_v32, %v2351_v11 }
 0xaf8   :  { %v1926_v33 = vpop.f32.mrf.mxu0 }
 0xaf9   :  { %v1279_v39 = vmax.f32 %v1273_v34, 0.0 }
 0xafa   :  { %v1275_v35 = vpop.f32.mrf.mxu0 }
 0xafb   :  { %v1276_v36 = vadd.f32 %v1275_v35, %v2355_v15 }
 0xafc   :  { %v1927_v37 = vpop.f32.mrf.mxu0 }
 0xafd   :  { %v1280_v40 = vmax.f32 %v1276_v36, 0.0 }
 0xaff   :  { %v1281_v42 = vpack.c.bf16 %v1280_v40, %v1279_v39 }
 0xb01   :  { %1931 = vmatmul.mubr.msk.bf16.vlgmr.msra.gmra.mxu1 %vm726_vm5, %v1281_v42 }
 0xb02   :  { %1936 = vmatprep.mubr.msk.bf16.mxu1 %vm1993_vm1, %v1992_v0  ;;  %1935 = vmatpush3.bf16.msra.mxu1 %v1339_v44  ;;  %v1392_v44 = vld [vmem:[%s2528_s22 + $0x10] sm:$0xff] }
 0xb03   :  { %1946 = vmatprep.subr.bf16.mxu1 %v1992_v0 }
 0xbc1   :  { %v1325_v11 = vpop.f32.mrf.mxu1 }
 0xbc3   :  { %v1932_v15 = vpop.f32.mrf.mxu1 }
 0xbc5   :  { %v1328_v45 = vpop.f32.mrf.mxu1 }
 0xbc6   :  { %v1333_v46 = vpack.c.bf16 %v1328_v45, %v1325_v11  ;;  %v1393_v45 = vld [vmem:[%s2528_s22 + $0x18] sm:$0xff] }
 0xbc7   :  { %v1933_v47 = vpop.f32.mrf.mxu1 }
 0xbc8   :  { %1937 = vmatmul.mubr.msk.bf16.vlgmr.msra.gmra.mxu1 %vm1334_vm7, %v1333_v46 }
 0xbc9   :  { %1950 = vmatprep.mubr.msk.bf16.mxu1 %vm1993_vm1, %v1992_v0 }
 0xc88   :  { %v1375_v49 = vpop.f32.mrf.mxu1 }
 0xc8a   :  { %v1938_v50 = vpop.f32.mrf.mxu1 }
 0xc8c   :  { %v1378_v51 = vpop.f32.mrf.mxu1 }
 0xc8d   :  { %v1398_v52 = vpack.c.bf16 %v1378_v51, %v1375_v49  ;;  %v1390_v49 = vld [vmem:[%s2528_s22] sm:$0xff] }
 0xc8e   :  { %v1939_v53 = vpop.f32.mrf.mxu1 }
 0xc8f   :  { %1940 = vmatprep.subr.bf16.mxu0 %v1398_v52 }
 0xc90   :  { %1941 = vmatpush3.bf16.msra.mxu0 %v1398_v52 }
 0xc93   :  { %1943 = vmatmul.mubr.msk.bf16.vlgmr.msra.gmra.mxu0 %vm726_vm5, %v1977_v54  ;;  %v1395_v54 = vld [vmem:[%s2527_s23 + $0x8] sm:$0xff] }
 0xd53   :  { %v1944_v57 = vpop.f32.mrf.mxu0 }
 0xd54   :  { %v1478_v38 = vadd.f32 %v1944_v57, %v1412_v56  ;;  %v1591_v56 = vld [vmem:[%s2529_s25] sm:$0xf] }
 0xd55   :  { %v1469_v58 = vpop.f32.mrf.mxu0 }
 0xd56   :  { %v1491_v59 = vsel %vm1484_vm8, %v1478_v38, 0.0  ;;  %v1470_v1 = vadd.f32 %v1469_v58, %v1402_v62 }
 0xd57   :  { %1492 = vadd.xlane.f32.xlu1 %v1491_v59  ;;  %v1945_v60 = vpop.f32.mrf.mxu0 }
 0xd58   :  { %v1481_v41 = vadd.f32 %v1945_v60, %v1417_v55  ;;  %v1485_v5 = vsel %vm1484_vm8, %v1470_v1, 0.0  ;;  %v1394_v55 = vld [vmem:[%s2527_s23] sm:$0xff] }
 0xd59   :  { %v1472_v63 = vpop.f32.mrf.mxu0 }
 0xd5a   :  { %v1473_v2 = vadd.f32 %v1472_v63, %v1407_v61  ;;  %v1494_v3 = vsel %vm1484_vm8, %v1481_v41, 0.0 }
 0xd5b   :  { %1495 = vadd.xlane.f32.xlu0 %v1494_v3 }
 0xd5c   :  { %v1488_v4 = vsel %vm1484_vm8, %v1473_v2, 0.0 }
 0xd5d   :  { %1489 = vadd.xlane.f32.xlu1 %v1488_v4 }
 0xd5f   :  { %1486 = vadd.xlane.f32.xlu0 %v1485_v5 }
 0xde0   :  { %v1493_v6 = vpop.xlane.xlu1 %1492 }
 0xde1   :  { %v1500_v7 = vmul.f32 0.5, %v1493_v6 }
 0xde3   :  { %v2446_v8 = vsub.f32 %v1478_v38, %v1500_v7 }
 0xde4   :  { %v1496_v9 = vpop.xlane.xlu0 %1495 }
 0xde5   :  { %v1501_v10 = vmul.f32 0.5, %v1496_v9  ;;  %v1508_v12 = vmul.f32 %v2446_v8, %v2446_v8 }
 0xde6   :  { %v1490_v13 = vpop.xlane.xlu1 %1489 }
 0xde7   :  { %v2450_v14 = vsub.f32 %v1481_v41, %v1501_v10  ;;  %v1499_v16 = vmul.f32 0.5, %v1490_v13  ;;  %v1516_v17 = vsel %vm1484_vm8, %v1508_v12, 0.0 }
 0xde8   :  { %1517 = vadd.xlane.f32.xlu0 %v1516_v17  ;;  %v1487_v18 = vpop.xlane.xlu0 %1486 }
 0xde9   :  { %v2453_v19 = vsub.f32 %v1473_v2, %v1499_v16  ;;  %v1498_v20 = vmul.f32 0.5, %v1487_v18  ;;  %v1509_v21 = vmul.f32 %v2450_v14, %v2450_v14  ;;  %v1590_v16 = vld [vmem:[%s2530_s24] sm:$0x3] }
 0xdeb   :  { %v2457_v22 = vsub.f32 %v1470_v1, %v1498_v20  ;;  %v1519_v23 = vsel %vm1484_vm8, %v1509_v21, 0.0  ;;  %v1507_v24 = vmul.f32 %v2453_v19, %v2453_v19 }
 0xdec   :  { %1520 = vadd.xlane.f32.xlu1 %v1519_v23 }
 0xded   :  { %v1506_v25 = vmul.f32 %v2457_v22, %v2457_v22  ;;  %v1513_v26 = vsel %vm1484_vm8, %v1507_v24, 0.0 }
 0xdef   :  { %v1510_v27 = vsel %vm1484_vm8, %v1506_v25, 0.0 }
 0xdf0   :  { %1514 = vadd.xlane.f32.xlu1 %v1513_v26  ;;  %1511 = vadd.xlane.f32.xlu0 %v1510_v27 }
 0xe01   :  { %1574 = vperm.xlu1 %1957, %v1396_v28  }
 0xe06   :  { %1579 = vperm.xlu0 %1958, %v1397_v29  }
 0xe71   :  { %v1518_v30 = vpop.xlane.xlu0 %1517 }
 0xe72   :  { %v1524_v31 = vmul.f32 0.5, %v1518_v30 }
 0xe74   :  { %v1528_v32 = vadd.f32 1e-05, %v1524_v31 }
 0xe75   :  { %v1521_v33 = vpop.xlane.xlu1 %1520 }
 0xe76   :  { %1984 = vrsqrt.f32 %v1528_v32  ;;  %v1525_v34 = vmul.f32 0.5, %v1521_v33 }
 0xe78   :  { %v1529_v35 = vadd.f32 1e-05, %v1525_v34 }
 0xe79   :  { %v1515_v36 = vpop.xlane.xlu1 %1514  ;;  %v1512_v37 = vpop.xlane.xlu0 %1511 }
 0xe7a   :  { %1986 = vrsqrt.f32 %v1529_v35  ;;  %v1523_v39 = vmul.f32 0.5, %v1515_v36  ;;  %v1522_v40 = vmul.f32 0.5, %v1512_v37 }
 0xe7c   :  { %v1527_v42 = vadd.f32 1e-05, %v1523_v39  ;;  %v1526_v43 = vadd.f32 1e-05, %v1522_v40 }
 0xe7d   :  { %v1575_v38 = vpop.permute.xlu1 %1574 }
 0xe7e   :  { %1988 = vrsqrt.f32 %v1527_v42 }
 0xe7f   :  { %1990 = vrsqrt.f32 %v1526_v43 }
 0xe81   :  { %v1580_v57 = vpop.permute.xlu0 %1579 }
 0xe83   :  { %v1985_v11 = vpop.eup %1984 }
 0xe84   :  { %v1536_v15 = vmul.f32 %v1985_v11, %v1392_v44 }
 0xe86   :  { %1550 = vperm.xlu0 %1958, %v1536_v15  }
 0xe87   :  { %v1987_v46 = vpop.eup %1986 }
 0xe88   :  { %v1537_v47 = vmul.f32 %v1987_v46, %v1393_v45 }
 0xe8a   :  { %1555 = vperm.xlu1 %1957, %v1537_v47  }
 0xe8b   :  { %v1989_v50 = vpop.eup %1988 }
 0xe8c   :  { %v1991_v51 = vpop.eup %1990  ;;  %v1535_v52 = vmul.f32 %v1989_v50, %v1391_v48 }
 0xe8d   :  { %v1534_v53 = vmul.f32 %v1991_v51, %v1390_v49 }
 0xe8e   :  { %1545 = vperm.xlu0 %1958, %v1535_v52  }
 0xe8f   :  { %1540 = vperm.xlu1 %1957, %v1534_v53  }
 0xe92   :  { %1569 = vperm.xlu0 %1958, %v1395_v54  }
 0xe93   :  { %1564 = vperm.xlu1 %1957, %v1394_v55  }
 0xe97   :  { %1596 = vperm.xlu1 %1957, %v1591_v56  }
 0xf01   :  { %v1551_v58 = vpop.permute.xlu0 %1550 }
 0xf02   :  { %v1560_v59 = vmul.f32 %v1551_v58, %v2446_v8 }
 0xf04   :  { %v1584_v61 = vadd.f32 %v1575_v38, %v1560_v59 }
 0xf05   :  { %v1556_v60 = vpop.permute.xlu1 %1555 }
 0xf06   :  { %v1561_v41 = vmul.f32 %v1556_v60, %v2450_v14  ;;  %v1588_v1 = vmax.f32 %v1584_v61, 0.0 }
 0xf08   :  { %v1585_v62 = vadd.f32 %v1580_v57, %v1561_v41 }
 0xf09   :  { %v1546_v63 = vpop.permute.xlu0 %1545 }
 0xf0a   :  { %v1589_v2 = vmax.f32 %v1585_v62, 0.0  ;;  %v1541_v3 = vpop.permute.xlu1 %1540  ;;  %v1559_v5 = vmul.f32 %v1546_v63, %v2453_v19 }
 0xf0b   :  { %v1558_v6 = vmul.f32 %v1541_v3, %v2457_v22 }
 0xf0c   :  { %v1593_v4 = vpack.c.bf16 %v1589_v2, %v1588_v1 }
 0xf0d   :  { %v1570_v7 = vpop.permute.xlu0 %1569 }
 0xf0e   :  { %v1565_v9 = vpop.permute.xlu1 %1564  ;;  %v1583_v10 = vadd.f32 %v1570_v7, %v1559_v5  ;;  %1947 = vmatpush3.bf16.msra.mxu1 %v1593_v4 }
 0xf0f   :  { %v1582_v12 = vadd.f32 %v1565_v9, %v1558_v6  ;;  %1948 = vmatprep.subr.bf16.mxu1 %v1992_v0 }
 0xf10   :  { %v1587_v8 = vmax.f32 %v1583_v10, 0.0 }
 0xf11   :  { %v1586_v13 = vmax.f32 %v1582_v12, 0.0 }
 0xf12   :  { %v1597_v17 = vpop.permute.xlu1 %1596 }
 0xf13   :  { %v1592_v14 = vpack.c.bf16 %v1587_v8, %v1586_v13 }
 0xf15   :  { %1949 = vmatpush3.bf16.msra.mxu1 %v1592_v14 }
 0xf18   :  { %1951 = vmatmul.mubr.msk.bf16.vlgmr.msra.gmra.mxu1 %vm84_vm0, %v1590_v16 }
 0xfd8   :  { %v1636_v18 = vpop.f32.mrf.mxu1 }
 0xfd9   :  { %v1637_v19 = vadd.f32 %v1636_v18, %v1597_v17 }
 0xfda   :  { %v1952_v20 = vpop.f32.mrf.mxu1 }
 0xfdb   :  { %1643 = vst.msk [vmem:[%s2531_s26] sm:$0xf] %vm1642_vm9, %v1637_v19 }
 0xfdc   :  { %v1639_v0 = vpop.f32.mrf.mxu1 }
 0xfde   :  { %v1953_v21 = vpop.f32.mrf.mxu1 }

</bundles_post_ra>
